<compile_context>
chip_gen: v5e
topology: v5e:2x2
jax: 0.10.0
libtpu: 0.0.40
codegen_flags: <defaults>
</compile_context>

<pallas_src>
import functools

import jax
import jax.numpy as jnp
import numpy as np
from jax.experimental import pallas as pl
from jax.experimental.pallas import tpu as pltpu


def lstm_fc_kernel(x_ref, len_ref, wih0_ref, b0_ref, whh0_ref, wcat_ref,
                   brest_ref, wfc_ref, bfc_ref, out_ref, h_sc, c_sc, proj_sc):
    """One (batch-tile, time-chunk) grid step of the L-layer LSTM + Linear head.

    x_ref    : [TT, TB, E]          bf16  embedded tokens (time-major chunk)
    len_ref  : [TB, 1]              i32   sequence lengths
    wih0_ref : [E, 4H]              bf16  layer-0 W_ih^T (PyTorch gate order i,f,g,o)
    b0_ref   : [1, 4H]              f32   layer-0 bias_ih + bias_hh
    whh0_ref : [H, 4H]              bf16  layer-0 W_hh^T
    wcat_ref : [max(L-1,1), 2H, 4H] bf16  layers>=1: [W_ih^T ; W_hh^T] stacked
    brest_ref: [max(L-1,1), 1, 4H]  f32   layers>=1: bias_ih + bias_hh
    wfc_ref  : [H, OP]              bf16  fc.weight^T zero-padded to OP(=128k) lanes
    bfc_ref  : [1, OP]              f32   fc.bias zero-padded
    out_ref  : [TB, OP]             f32   fc(last-layer final hidden state)
    h_sc,c_sc: [L, TB, H]           f32   persistent hidden / cell state scratch
    proj_sc  : [TT, TB, 4H]         f32   precomputed layer-0 input projection
    """
    TT, TB, E = x_ref.shape
    L, _, H = h_sc.shape
    G = 4 * H

    chunk = pl.program_id(1)

    @pl.when(chunk == 0)
    def _init():
        h_sc[...] = jnp.zeros_like(h_sc)
        c_sc[...] = jnp.zeros_like(c_sc)

    # ---- Layer-0 input projection for the whole chunk: one large MXU matmul,
    #      off the serial recurrence; bias folded in once here. The f32
    #      round-trip makes the leading-dim merge a trivial tile-aligned
    #      relayout (TB is a multiple of 8).
    x_flat = (x_ref[...].astype(jnp.float32)
              .reshape(TT * TB, E).astype(jnp.bfloat16))
    proj = jnp.dot(x_flat, wih0_ref[...],
                   preferred_element_type=jnp.float32) + b0_ref[...]
    proj_sc[...] = proj.reshape(TT, TB, G)

    # ---- Loop-invariant hoists (JAX does not CSE broadcasts inside loops). ----
    lens_bh = jnp.broadcast_to(len_ref[...], (TB, H))                  # [TB, H] i32
    biases = [jnp.broadcast_to(brest_ref[l - 1], (TB, G)) for l in range(1, L)]
    t_base = chunk * TT

    def lstm_cell(gates, h_prev, c_prev, valid):
        # 2 full-width EUP passes (sigmoid via tanh identity) instead of 4
        # lane-sliced ones; gate math stays in f32.
        sg = 0.5 * jnp.tanh(0.5 * gates) + 0.5       # sigmoid(gates) on [TB,4H]
        th = jnp.tanh(gates)
        i_g = sg[:, 0 * H:1 * H]
        f_g = sg[:, 1 * H:2 * H]
        g_g = th[:, 2 * H:3 * H]
        o_g = sg[:, 3 * H:4 * H]
        c_new = f_g * c_prev + i_g * g_g
        h_new = o_g * jnp.tanh(c_new)
        # Packed-sequence semantics: state frozen past each sequence's length.
        return jnp.where(valid, h_new, h_prev), jnp.where(valid, c_new, c_prev)

    def step(t, carry):
        valid = (t_base + t) < lens_bh                                 # [TB, H]

        # Layer 0: only the recurrent matmul sits on the per-step chain.
        h0, c0 = h_sc[0], c_sc[0]
        gates0 = proj_sc[t] + jnp.dot(h0.astype(jnp.bfloat16), whh0_ref[...],
                                      preferred_element_type=jnp.float32)
        h0, c0 = lstm_cell(gates0, h0, c0, valid)
        h_sc[0] = h0
        c_sc[0] = c0
        layer_in = h0

        # Layers >= 1: one fused [x ; h] @ [[W_ih^T];[W_hh^T]] matmul per layer.
        for l in range(1, L):                                          # static unroll
            hp, cp = h_sc[l], c_sc[l]
            xin = jnp.concatenate([layer_in, hp], axis=1).astype(jnp.bfloat16)
            gates = jnp.dot(xin, wcat_ref[l - 1],
                            preferred_element_type=jnp.float32) + biases[l - 1]
            hl, cl = lstm_cell(gates, hp, cp, valid)
            h_sc[l] = hl
            c_sc[l] = cl
            layer_in = hl
        return carry

    jax.lax.fori_loop(0, TT, step, 0, unroll=True)

    # ---- Linear head on the final top-layer hidden state (lane-dense store). ----
    @pl.when(chunk == pl.num_programs(1) - 1)
    def _finalize():
        last_h = h_sc[L - 1].astype(jnp.bfloat16)
        out_ref[...] = (jnp.dot(last_h, wfc_ref[...],
                                preferred_element_type=jnp.float32)
                        + bfc_ref[...])


@functools.partial(
    jax.jit,
    static_argnames=("layers_n", "hidden_size", "output_size", "time_tile",
                     "batch_tile"))
def rnn_model_forward(input_ids, text_lengths, kparams, *, layers_n, hidden_size,
                      output_size, time_tile=8, batch_tile=None):
    """JAX wrapper mirroring RNNModel.forward (batch_first input_ids [B, T])."""
    L, H, O = layers_n, hidden_size, output_size
    G = 4 * H
    B, T = input_ids.shape
    E = kparams["embedding"].shape[1]
    OP = kparams["w_fc_t"].shape[1]

    # TODO(synk): embedding gather stays in XLA; a Pallas version would need
    # manual per-row DMA (no clean dense-tile equivalent for arbitrary vocab gather).
    embedded = jnp.take(kparams["embedding"], input_ids, axis=0)       # [B, T, E]
    x_tbe = jnp.transpose(embedded, (1, 0, 2)).astype(jnp.bfloat16)    # [T, B, E]

    TT = time_tile
    if batch_tile is None:
        B_pad = -(-B // 8) * 8
        TB = B_pad                                   # single batch tile
    else:
        TB = batch_tile
        assert TB % 8 == 0, "batch_tile must be a multiple of 8"
        B_pad = -(-B // TB) * TB
    T_pad = -(-T // TT) * TT

    # Pad time/batch; padded rows get length 0 so their state stays frozen.
    x_tbe = jnp.pad(x_tbe, ((0, T_pad - T), (0, B_pad - B), (0, 0)))
    lens = jnp.pad(text_lengths.astype(jnp.int32), (0, B_pad - B)).reshape(B_pad, 1)

    Lm1 = max(L - 1, 1)
    # Explicit scoped-VMEM budget (defaults differ across v5e/v6e/v7x); derived
    # from actual tile sizes with headroom, clamped to a safe range.
    buf_bytes = (
        2 * TT * TB * E * 2                                    # x chunk, double-buffered, bf16
        + 2 * TB * 4                                           # lens
        + 2 * (E * G + H * G + Lm1 * 2 * H * G + H * OP) * 2   # bf16 weights
        + 2 * (G + Lm1 * G + OP) * 4                           # f32 biases
        + 2 * TB * OP * 4                                      # output block
        + (2 * L * TB * H + TT * TB * G) * 4                   # scratch (h, c, proj)
    )
    vmem_limit = int(min(max(2 * buf_bytes, 16 * 1024 * 1024), 64 * 1024 * 1024))

    fc_pad = pl.pallas_call(
        lstm_fc_kernel,
        out_shape=jax.ShapeDtypeStruct((B_pad, OP), jnp.float32),
        grid_spec=pltpu.PrefetchScalarGridSpec(
            num_scalar_prefetch=0,
            grid=(B_pad // TB, T_pad // TT),
            in_specs=[
                pl.BlockSpec((TT, TB, E), lambda b, c: (c, b, 0)),        # x (streamed)
                pl.BlockSpec((TB, 1), lambda b, c: (b, 0)),               # lengths
                pl.BlockSpec((E, G), lambda b, c: (0, 0)),                # W_ih0^T
                pl.BlockSpec((1, G), lambda b, c: (0, 0)),                # b0
                pl.BlockSpec((H, G), lambda b, c: (0, 0)),                # W_hh0^T
                pl.BlockSpec((Lm1, 2 * H, G), lambda b, c: (0, 0, 0)),    # fused W, l>=1
                pl.BlockSpec((Lm1, 1, G), lambda b, c: (0, 0, 0)),        # biases, l>=1
                pl.BlockSpec((H, OP), lambda b, c: (0, 0)),               # fc W^T (padded)
                pl.BlockSpec((1, OP), lambda b, c: (0, 0)),               # fc bias (padded)
            ],
            out_specs=pl.BlockSpec((TB, OP), lambda b, c: (b, 0)),
            scratch_shapes=[
                pltpu.VMEM((L, TB, H), jnp.float32),       # hidden state
                pltpu.VMEM((L, TB, H), jnp.float32),       # cell state
                pltpu.VMEM((TT, TB, G), jnp.float32),      # layer-0 projection
            ],
        ),
        compiler_params=pltpu.CompilerParams(
            dimension_semantics=("parallel", "arbitrary"),
            vmem_limit_bytes=vmem_limit,
        ),
    )(x_tbe, lens, kparams["w_ih0_t"], kparams["b0"], kparams["w_hh0_t"],
      kparams["w_cat"], kparams["b_rest"], kparams["w_fc_t"], kparams["b_fc"])

    fc_out = fc_pad[:B, :O]
    if O == 1:
        fc_out = jnp.squeeze(fc_out, axis=1)        # fc_out.squeeze(1) -> (B,)
    return fc_out


def init_params(key, vocab_size, input_size, hidden_size, layers_n, output_size):
    """Synthetic parameters in PyTorch layout (Embedding / LSTM / Linear)."""
    scale = 0.1
    keys = jax.random.split(key, 4)
    embedding = jax.random.normal(keys[0], (vocab_size, input_size), jnp.float32) * scale
    lstm = []
    for l in range(layers_n):
        in_dim = input_size if l == 0 else hidden_size
        k1, k2, k3, k4 = jax.random.split(jax.random.fold_in(keys[1], l), 4)
        lstm.append((
            jax.random.normal(k1, (4 * hidden_size, in_dim), jnp.float32) * scale,       # W_ih
            jax.random.normal(k2, (4 * hidden_size, hidden_size), jnp.float32) * scale,  # W_hh
            jax.random.normal(k3, (4 * hidden_size,), jnp.float32) * scale,              # b_ih
            jax.random.normal(k4, (4 * hidden_size,), jnp.float32) * scale,              # b_hh
        ))
    w_fc = jax.random.normal(keys[2], (output_size, hidden_size), jnp.float32) * scale
    b_fc = jax.random.normal(keys[3], (output_size,), jnp.float32) * scale
    return {"embedding": embedding, "lstm": lstm, "w_fc": w_fc, "b_fc": b_fc}


def pack_params(params, *, hidden_size, layers_n, output_size):
    """Pre-transpose / stack / pad / cast PyTorch-layout weights for the kernel."""
    H, L, O = hidden_size, layers_n, output_size
    G = 4 * H
    OP = -(-O // 128) * 128                                    # lane-dense FC width

    w_ih0, w_hh0, b_ih0, b_hh0 = params["lstm"][0]
    if L > 1:
        w_cat = jnp.stack([jnp.concatenate([w_ih.T, w_hh.T], axis=0)
                           for (w_ih, w_hh, _, _) in params["lstm"][1:]], axis=0)
        b_rest = jnp.stack([(b_ih + b_hh).reshape(1, G)
                            for (_, _, b_ih, b_hh) in params["lstm"][1:]], axis=0)
    else:
        w_cat = jnp.zeros((1, 2 * H, G), jnp.float32)          # unused dummy
        b_rest = jnp.zeros((1, 1, G), jnp.float32)

    w_fc_pad = jnp.zeros((H, OP), jnp.float32).at[:, :O].set(params["w_fc"].T)
    b_fc_pad = jnp.zeros((1, OP), jnp.float32).at[:, :O].set(params["b_fc"][None, :])

    return {
        "embedding": params["embedding"],                      # [V, E] f32
        "w_ih0_t": w_ih0.T.astype(jnp.bfloat16),               # [E, 4H]
        "b0": (b_ih0 + b_hh0).reshape(1, G),                   # [1, 4H] f32
        "w_hh0_t": w_hh0.T.astype(jnp.bfloat16),               # [H, 4H]
        "w_cat": w_cat.astype(jnp.bfloat16),                   # [max(L-1,1), 2H, 4H]
        "b_rest": b_rest,                                      # [max(L-1,1), 1, 4H] f32
        "w_fc_t": w_fc_pad.astype(jnp.bfloat16),               # [H, OP]
        "b_fc": b_fc_pad,                                      # [1, OP] f32
    }


def reference_forward(params, input_ids, text_lengths, *, hidden_size, layers_n,
                      output_size):
    """Pure-JAX f32 reference reproducing RNNModel.forward (for verification)."""
    H, L, O = hidden_size, layers_n, output_size
    emb = jnp.take(params["embedding"], input_ids, axis=0)     # [B, T, E]
    B, T, _ = emb.shape
    lens = text_lengths.astype(jnp.int32)
    h0 = jnp.zeros((L, B, H), jnp.float32)
    c0 = jnp.zeros((L, B, H), jnp.float32)

    def step(carry, inp):
        h, c = carry
        x_t, t = inp
        valid = (t < lens)[:, None]
        layer_in = x_t
        h_new, c_new = [], []
        for l in range(L):
            w_ih, w_hh, b_ih, b_hh = params["lstm"][l]
            gates = layer_in @ w_ih.T + h[l] @ w_hh.T + b_ih + b_hh
            i_g = jax.nn.sigmoid(gates[:, :H])
            f_g = jax.nn.sigmoid(gates[:, H:2 * H])
            g_g = jnp.tanh(gates[:, 2 * H:3 * H])
            o_g = jax.nn.sigmoid(gates[:, 3 * H:])
            c_n = f_g * c[l] + i_g * g_g
            h_n = o_g * jnp.tanh(c_n)
            h_new.append(jnp.where(valid, h_n, h[l]))
            c_new.append(jnp.where(valid, c_n, c[l]))
            layer_in = h_new[-1]
        return (jnp.stack(h_new), jnp.stack(c_new)), None

    xs = (jnp.transpose(emb, (1, 0, 2)), jnp.arange(T))
    (h, _), _ = jax.lax.scan(step, (h0, c0), xs)
    fc = h[-1] @ params["w_fc"].T + params["b_fc"]
    return jnp.squeeze(fc, axis=1) if O == 1 else fc


if __name__ == "__main__":
    VOCAB = 50
    INPUT_SIZE = 48      # embedding dim == LSTM input_size (E != H now supported)
    HIDDEN = 32
    LAYERS = 2
    OUTPUT = 1           # output_size = 1 so fc_out.squeeze(1) -> (B,)
    B, T = 8, 12         # T deliberately not a multiple of the time tile

    key = jax.random.PRNGKey(0)
    k_tok, k_len, k_par = jax.random.split(key, 3)

    input_ids = jax.random.randint(k_tok, (B, T), 0, VOCAB, dtype=jnp.int32)
    text_lengths = jax.random.randint(k_len, (B,), 1, T + 1, dtype=jnp.int32)

    params = init_params(k_par, VOCAB, INPUT_SIZE, HIDDEN, LAYERS, OUTPUT)
    kparams = pack_params(params, hidden_size=HIDDEN, layers_n=LAYERS,
                          output_size=OUTPUT)

    out = rnn_model_forward(input_ids, text_lengths, kparams,
                            layers_n=LAYERS, hidden_size=HIDDEN,
                            output_size=OUTPUT, time_tile=8)
    jax.block_until_ready(out)
    assert out.shape == (B,), out.shape

    ref = reference_forward(params, input_ids, text_lengths, hidden_size=HIDDEN,
                            layers_n=LAYERS, output_size=OUTPUT)
    np.testing.assert_allclose(np.asarray(out), np.asarray(ref),
                               rtol=2e-2, atol=2e-2)
    print("KERNEL_OK")
</pallas_src>

<mosaic_0001>
module attributes {stable_mosaic.version = 11 : i64} {
  func.func @lstm_fc_kernel(%arg0: i32, %arg1: i32, %arg2: memref<8x8x48xbf16, #tpu.memory_space<vmem>>, %arg3: memref<8x1xi32, #tpu.memory_space<vmem>>, %arg4: memref<48x128xbf16, #tpu.memory_space<vmem>>, %arg5: memref<1x128xf32, #tpu.memory_space<vmem>>, %arg6: memref<32x128xbf16, #tpu.memory_space<vmem>>, %arg7: memref<1x64x128xbf16, #tpu.memory_space<vmem>>, %arg8: memref<1x1x128xf32, #tpu.memory_space<vmem>>, %arg9: memref<32x128xbf16, #tpu.memory_space<vmem>>, %arg10: memref<1x128xf32, #tpu.memory_space<vmem>>, %arg11: memref<8x128xf32, #tpu.memory_space<vmem>>, %arg12: memref<2x8x32xf32, #tpu.memory_space<vmem>>, %arg13: memref<2x8x32xf32, #tpu.memory_space<vmem>>, %arg14: memref<8x8x128xf32, #tpu.memory_space<vmem>>) attributes {dimension_semantics = [#tpu.dimension_semantics<parallel>, #tpu.dimension_semantics<arbitrary>], iteration_bounds = array<i64: 1, 2>, scalar_prefetch = 0 : i64, scratch_operands = 3 : i64, tpu.core_type = #tpu.core_type<tc>, window_params = [{transform_indices = @transform_0, window_bounds = array<i64: 8, 8, 48>}, {transform_indices = @transform_1, window_bounds = array<i64: 8, 1>}, {pipeline_mode = #tpu.pipeline_mode<synchronous>, transform_indices = @transform_2, window_bounds = array<i64: 48, 128>}, {pipeline_mode = #tpu.pipeline_mode<synchronous>, transform_indices = @transform_3, window_bounds = array<i64: 1, 128>}, {pipeline_mode = #tpu.pipeline_mode<synchronous>, transform_indices = @transform_4, window_bounds = array<i64: 32, 128>}, {pipeline_mode = #tpu.pipeline_mode<synchronous>, transform_indices = @transform_5, window_bounds = array<i64: 1, 64, 128>}, {pipeline_mode = #tpu.pipeline_mode<synchronous>, transform_indices = @transform_6, window_bounds = array<i64: 1, 1, 128>}, {pipeline_mode = #tpu.pipeline_mode<synchronous>, transform_indices = @transform_7, window_bounds = array<i64: 32, 128>}, {pipeline_mode = #tpu.pipeline_mode<synchronous>, transform_indices = @transform_8, window_bounds = array<i64: 1, 128>}, {transform_indices = @transform_9, window_bounds = array<i64: 8, 128>}]} {
    %c0_i32 = arith.constant 0 : i32
    %0 = arith.cmpi eq, %arg1, %c0_i32 : i32
    %1 = arith.extui %0 : i1 to i32
    %c0_i32_0 = arith.constant 0 : i32
    %2 = arith.cmpi ne, %1, %c0_i32_0 : i32
    scf.if %2 {
      %cst_330 = arith.constant 0.000000e+00 : f32
      %617 = vector.broadcast %cst_330 : f32 to vector<2x8x32xf32>
      %c0_331 = arith.constant 0 : index
      %c0_332 = arith.constant 0 : index
      %c0_333 = arith.constant 0 : index
      %618 = vector.load %arg12[%c0_331, %c0_332, %c0_333] : memref<2x8x32xf32, #tpu.memory_space<vmem>>, vector<2x8x32xf32>
      tpu.vector_store %arg12[%c0_331, %c0_332, %c0_333], %617 {strides = array<i32>} : memref<2x8x32xf32, #tpu.memory_space<vmem>>, vector<2x8x32xf32>,
      %cst_334 = arith.constant 0.000000e+00 : f32
      %619 = vector.broadcast %cst_334 : f32 to vector<2x8x32xf32>
      %c0_335 = arith.constant 0 : index
      %c0_336 = arith.constant 0 : index
      %c0_337 = arith.constant 0 : index
      %620 = vector.load %arg13[%c0_335, %c0_336, %c0_337] : memref<2x8x32xf32, #tpu.memory_space<vmem>>, vector<2x8x32xf32>
      tpu.vector_store %arg13[%c0_335, %c0_336, %c0_337], %619 {strides = array<i32>} : memref<2x8x32xf32, #tpu.memory_space<vmem>>, vector<2x8x32xf32>,
    } else {
    }
    %c0 = arith.constant 0 : index
    %c0_1 = arith.constant 0 : index
    %c0_2 = arith.constant 0 : index
    %3 = vector.load %arg2[%c0, %c0_1, %c0_2] : memref<8x8x48xbf16, #tpu.memory_space<vmem>>, vector<8x8x48xbf16>
    %4 = arith.extf %3 : vector<8x8x48xbf16> to vector<8x8x48xf32>
    %5 = vector.shape_cast %4 : vector<8x8x48xf32> to vector<64x48xf32>
    %6 = arith.truncf %5 : vector<64x48xf32> to vector<64x48xbf16>
    %c0_3 = arith.constant 0 : index
    %c0_4 = arith.constant 0 : index
    %7 = vector.load %arg4[%c0_3, %c0_4] : memref<48x128xbf16, #tpu.memory_space<vmem>>, vector<48x128xbf16>
    %cst = arith.constant dense<0.000000e+00> : vector<64x128xf32>
    %8 = tpu.matmul %6, %7, %cst {dimension_numbers = #tpu.dot_dimension_numbers<[1], [0], [0], [1], [0, 0, 1, 1], [], []>} : vector<64x48xbf16>, vector<48x128xbf16>, vector<64x128xf32> -> vector<64x128xf32>
    %c0_5 = arith.constant 0 : index
    %c0_6 = arith.constant 0 : index
    %9 = vector.load %arg5[%c0_5, %c0_6] : memref<1x128xf32, #tpu.memory_space<vmem>>, vector<1x128xf32>
    %10 = vector.broadcast %9 : vector<1x128xf32> to vector<64x128xf32>
    %11 = arith.addf %8, %10 : vector<64x128xf32>
    %12 = vector.shape_cast %11 : vector<64x128xf32> to vector<8x8x128xf32>
    %c0_7 = arith.constant 0 : index
    %c0_8 = arith.constant 0 : index
    %c0_9 = arith.constant 0 : index
    %13 = vector.load %arg14[%c0_7, %c0_8, %c0_9] : memref<8x8x128xf32, #tpu.memory_space<vmem>>, vector<8x8x128xf32>
    tpu.vector_store %arg14[%c0_7, %c0_8, %c0_9], %12 {strides = array<i32>} : memref<8x8x128xf32, #tpu.memory_space<vmem>>, vector<8x8x128xf32>,
    %c0_10 = arith.constant 0 : index
    %c0_11 = arith.constant 0 : index
    %14 = vector.load %arg3[%c0_10, %c0_11] : memref<8x1xi32, #tpu.memory_space<vmem>>, vector<8x1xi32>
    %15 = vector.shape_cast %14 : vector<8x1xi32> to vector<8x1xi32>
    %16 = vector.broadcast %15 : vector<8x1xi32> to vector<8x32xi32>
    %c0_12 = arith.constant 0 : index
    %c0_13 = arith.constant 0 : index
    %c0_14 = arith.constant 0 : index
    %17 = vector.load %arg8[%c0_12, %c0_13, %c0_14] : memref<1x1x128xf32, #tpu.memory_space<vmem>>, vector<1x1x128xf32>
    %18 = vector.shape_cast %17 : vector<1x1x128xf32> to vector<1x128xf32>
    %19 = vector.shape_cast %18 : vector<1x128xf32> to vector<1x128xf32>
    %20 = vector.broadcast %19 : vector<1x128xf32> to vector<8x128xf32>
    %c8_i32 = arith.constant 8 : i32
    %21 = arith.muli %arg1, %c8_i32 : i32
    %c0_i32_15 = arith.constant 0 : i32
    %22 = arith.addi %21, %c0_i32_15 : i32
    %23 = vector.broadcast %22 : i32 to vector<8x32xi32>
    %24 = arith.cmpi slt, %23, %16 : vector<8x32xi32>
    %c0_16 = arith.constant 0 : index
    %c0_17 = arith.constant 0 : index
    %c0_18 = arith.constant 0 : index
    %25 = vector.load %arg12[%c0_16, %c0_17, %c0_18] : memref<2x8x32xf32, #tpu.memory_space<vmem>>, vector<1x8x32xf32>
    %26 = vector.shape_cast %25 : vector<1x8x32xf32> to vector<8x32xf32>
    %c0_19 = arith.constant 0 : index
    %c0_20 = arith.constant 0 : index
    %c0_21 = arith.constant 0 : index
    %27 = vector.load %arg13[%c0_19, %c0_20, %c0_21] : memref<2x8x32xf32, #tpu.memory_space<vmem>>, vector<1x8x32xf32>
    %28 = vector.shape_cast %27 : vector<1x8x32xf32> to vector<8x32xf32>
    %29 = arith.index_cast %c0_i32_15 : i32 to index
    %c0_22 = arith.constant 0 : index
    %c0_23 = arith.constant 0 : index
    %30 = vector.load %arg14[%29, %c0_22, %c0_23] : memref<8x8x128xf32, #tpu.memory_space<vmem>>, vector<1x8x128xf32>
    %31 = vector.shape_cast %30 : vector<1x8x128xf32> to vector<8x128xf32>
    %32 = arith.truncf %26 : vector<8x32xf32> to vector<8x32xbf16>
    %c0_24 = arith.constant 0 : index
    %c0_25 = arith.constant 0 : index
    %33 = vector.load %arg6[%c0_24, %c0_25] : memref<32x128xbf16, #tpu.memory_space<vmem>>, vector<32x128xbf16>
    %cst_26 = arith.constant dense<0.000000e+00> : vector<8x128xf32>
    %34 = tpu.matmul %32, %33, %cst_26 {dimension_numbers = #tpu.dot_dimension_numbers<[1], [0], [0], [1], [0, 0, 1, 1], [], []>} : vector<8x32xbf16>, vector<32x128xbf16>, vector<8x128xf32> -> vector<8x128xf32>
    %35 = arith.addf %31, %34 : vector<8x128xf32>
    %cst_27 = arith.constant 5.000000e-01 : f32
    %36 = vector.broadcast %cst_27 : f32 to vector<8x128xf32>
    %37 = arith.mulf %36, %35 : vector<8x128xf32>
    %38 = math.tanh %37 : vector<8x128xf32>
    %cst_28 = arith.constant 5.000000e-01 : f32
    %39 = vector.broadcast %cst_28 : f32 to vector<8x128xf32>
    %40 = arith.mulf %39, %38 : vector<8x128xf32>
    %cst_29 = arith.constant 5.000000e-01 : f32
    %41 = vector.broadcast %cst_29 : f32 to vector<8x128xf32>
    %42 = arith.addf %40, %41 : vector<8x128xf32>
    %43 = math.tanh %35 : vector<8x128xf32>
    %44 = vector.extract_strided_slice %42 {offsets = [0, 0], sizes = [8, 32], strides = [1, 1]} : vector<8x128xf32> to vector<8x32xf32>
    %45 = vector.extract_strided_slice %42 {offsets = [0, 32], sizes = [8, 32], strides = [1, 1]} : vector<8x128xf32> to vector<8x32xf32>
    %46 = vector.extract_strided_slice %43 {offsets = [0, 64], sizes = [8, 32], strides = [1, 1]} : vector<8x128xf32> to vector<8x32xf32>
    %47 = vector.extract_strided_slice %42 {offsets = [0, 96], sizes = [8, 32], strides = [1, 1]} : vector<8x128xf32> to vector<8x32xf32>
    %48 = arith.mulf %45, %28 : vector<8x32xf32>
    %49 = arith.mulf %44, %46 : vector<8x32xf32>
    %50 = arith.addf %48, %49 : vector<8x32xf32>
    %51 = math.tanh %50 : vector<8x32xf32>
    %52 = arith.mulf %47, %51 : vector<8x32xf32>
    %53 = arith.select %24, %52, %26 : vector<8x32xi1>, vector<8x32xf32>
    %54 = arith.select %24, %50, %28 : vector<8x32xi1>, vector<8x32xf32>
    %c0_30 = arith.constant 0 : index
    %c0_31 = arith.constant 0 : index
    %c0_32 = arith.constant 0 : index
    %55 = vector.load %arg12[%c0_30, %c0_31, %c0_32] : memref<2x8x32xf32, #tpu.memory_space<vmem>>, vector<1x8x32xf32>
    %56 = vector.shape_cast %55 : vector<1x8x32xf32> to vector<8x32xf32>
    %57 = vector.shape_cast %53 : vector<8x32xf32> to vector<1x8x32xf32>
    tpu.vector_store %arg12[%c0_30, %c0_31, %c0_32], %57 {strides = array<i32>} : memref<2x8x32xf32, #tpu.memory_space<vmem>>, vector<1x8x32xf32>,
    %c0_33 = arith.constant 0 : index
    %c0_34 = arith.constant 0 : index
    %c0_35 = arith.constant 0 : index
    %58 = vector.load %arg13[%c0_33, %c0_34, %c0_35] : memref<2x8x32xf32, #tpu.memory_space<vmem>>, vector<1x8x32xf32>
    %59 = vector.shape_cast %58 : vector<1x8x32xf32> to vector<8x32xf32>
    %60 = vector.shape_cast %54 : vector<8x32xf32> to vector<1x8x32xf32>
    tpu.vector_store %arg13[%c0_33, %c0_34, %c0_35], %60 {strides = array<i32>} : memref<2x8x32xf32, #tpu.memory_space<vmem>>, vector<1x8x32xf32>,
    %c1 = arith.constant 1 : index
    %c0_36 = arith.constant 0 : index
    %c0_37 = arith.constant 0 : index
    %61 = vector.load %arg12[%c1, %c0_36, %c0_37] : memref<2x8x32xf32, #tpu.memory_space<vmem>>, vector<1x8x32xf32>
    %62 = vector.shape_cast %61 : vector<1x8x32xf32> to vector<8x32xf32>
    %c1_38 = arith.constant 1 : index
    %c0_39 = arith.constant 0 : index
    %c0_40 = arith.constant 0 : index
    %63 = vector.load %arg13[%c1_38, %c0_39, %c0_40] : memref<2x8x32xf32, #tpu.memory_space<vmem>>, vector<1x8x32xf32>
    %64 = vector.shape_cast %63 : vector<1x8x32xf32> to vector<8x32xf32>
    %65 = tpu.concatenate %53, %62 in 1 : vector<8x32xf32>, vector<8x32xf32> -> vector<8x64xf32>
    %66 = arith.truncf %65 : vector<8x64xf32> to vector<8x64xbf16>
    %c0_41 = arith.constant 0 : index
    %c0_42 = arith.constant 0 : index
    %c0_43 = arith.constant 0 : index
    %67 = vector.load %arg7[%c0_41, %c0_42, %c0_43] : memref<1x64x128xbf16, #tpu.memory_space<vmem>>, vector<1x64x128xbf16>
    %68 = vector.shape_cast %67 : vector<1x64x128xbf16> to vector<64x128xbf16>
    %cst_44 = arith.constant dense<0.000000e+00> : vector<8x128xf32>
    %69 = tpu.matmul %66, %68, %cst_44 {dimension_numbers = #tpu.dot_dimension_numbers<[1], [0], [0], [1], [0, 0, 1, 1], [], []>} : vector<8x64xbf16>, vector<64x128xbf16>, vector<8x128xf32> -> vector<8x128xf32>
    %70 = arith.addf %69, %20 : vector<8x128xf32>
    %cst_45 = arith.constant 5.000000e-01 : f32
    %71 = vector.broadcast %cst_45 : f32 to vector<8x128xf32>
    %72 = arith.mulf %71, %70 : vector<8x128xf32>
    %73 = math.tanh %72 : vector<8x128xf32>
    %cst_46 = arith.constant 5.000000e-01 : f32
    %74 = vector.broadcast %cst_46 : f32 to vector<8x128xf32>
    %75 = arith.mulf %74, %73 : vector<8x128xf32>
    %cst_47 = arith.constant 5.000000e-01 : f32
    %76 = vector.broadcast %cst_47 : f32 to vector<8x128xf32>
    %77 = arith.addf %75, %76 : vector<8x128xf32>
    %78 = math.tanh %70 : vector<8x128xf32>
    %79 = vector.extract_strided_slice %77 {offsets = [0, 0], sizes = [8, 32], strides = [1, 1]} : vector<8x128xf32> to vector<8x32xf32>
    %80 = vector.extract_strided_slice %77 {offsets = [0, 32], sizes = [8, 32], strides = [1, 1]} : vector<8x128xf32> to vector<8x32xf32>
    %81 = vector.extract_strided_slice %78 {offsets = [0, 64], sizes = [8, 32], strides = [1, 1]} : vector<8x128xf32> to vector<8x32xf32>
    %82 = vector.extract_strided_slice %77 {offsets = [0, 96], sizes = [8, 32], strides = [1, 1]} : vector<8x128xf32> to vector<8x32xf32>
    %83 = arith.mulf %80, %64 : vector<8x32xf32>
    %84 = arith.mulf %79, %81 : vector<8x32xf32>
    %85 = arith.addf %83, %84 : vector<8x32xf32>
    %86 = math.tanh %85 : vector<8x32xf32>
    %87 = arith.mulf %82, %86 : vector<8x32xf32>
    %88 = arith.select %24, %87, %62 : vector<8x32xi1>, vector<8x32xf32>
    %89 = arith.select %24, %85, %64 : vector<8x32xi1>, vector<8x32xf32>
    %c1_48 = arith.constant 1 : index
    %c0_49 = arith.constant 0 : index
    %c0_50 = arith.constant 0 : index
    %90 = vector.load %arg12[%c1_48, %c0_49, %c0_50] : memref<2x8x32xf32, #tpu.memory_space<vmem>>, vector<1x8x32xf32>
    %91 = vector.shape_cast %90 : vector<1x8x32xf32> to vector<8x32xf32>
    %92 = vector.shape_cast %88 : vector<8x32xf32> to vector<1x8x32xf32>
    tpu.vector_store %arg12[%c1_48, %c0_49, %c0_50], %92 {strides = array<i32>} : memref<2x8x32xf32, #tpu.memory_space<vmem>>, vector<1x8x32xf32>,
    %c1_51 = arith.constant 1 : index
    %c0_52 = arith.constant 0 : index
    %c0_53 = arith.constant 0 : index
    %93 = vector.load %arg13[%c1_51, %c0_52, %c0_53] : memref<2x8x32xf32, #tpu.memory_space<vmem>>, vector<1x8x32xf32>
    %94 = vector.shape_cast %93 : vector<1x8x32xf32> to vector<8x32xf32>
    %95 = vector.shape_cast %89 : vector<8x32xf32> to vector<1x8x32xf32>
    tpu.vector_store %arg13[%c1_51, %c0_52, %c0_53], %95 {strides = array<i32>} : memref<2x8x32xf32, #tpu.memory_space<vmem>>, vector<1x8x32xf32>,
    %c1_i32 = arith.constant 1 : i32
    %96 = arith.addi %21, %c1_i32 : i32
    %97 = vector.broadcast %96 : i32 to vector<8x32xi32>
    %98 = arith.cmpi slt, %97, %16 : vector<8x32xi32>
    %c0_54 = arith.constant 0 : index
    %c0_55 = arith.constant 0 : index
    %c0_56 = arith.constant 0 : index
    %99 = vector.load %arg12[%c0_54, %c0_55, %c0_56] : memref<2x8x32xf32, #tpu.memory_space<vmem>>, vector<1x8x32xf32>
    %100 = vector.shape_cast %99 : vector<1x8x32xf32> to vector<8x32xf32>
    %c0_57 = arith.constant 0 : index
    %c0_58 = arith.constant 0 : index
    %c0_59 = arith.constant 0 : index
    %101 = vector.load %arg13[%c0_57, %c0_58, %c0_59] : memref<2x8x32xf32, #tpu.memory_space<vmem>>, vector<1x8x32xf32>
    %102 = vector.shape_cast %101 : vector<1x8x32xf32> to vector<8x32xf32>
    %103 = arith.index_cast %c1_i32 : i32 to index
    %c0_60 = arith.constant 0 : index
    %c0_61 = arith.constant 0 : index
    %104 = vector.load %arg14[%103, %c0_60, %c0_61] : memref<8x8x128xf32, #tpu.memory_space<vmem>>, vector<1x8x128xf32>
    %105 = vector.shape_cast %104 : vector<1x8x128xf32> to vector<8x128xf32>
    %106 = arith.truncf %100 : vector<8x32xf32> to vector<8x32xbf16>
    %c0_62 = arith.constant 0 : index
    %c0_63 = arith.constant 0 : index
    %107 = vector.load %arg6[%c0_62, %c0_63] : memref<32x128xbf16, #tpu.memory_space<vmem>>, vector<32x128xbf16>
    %cst_64 = arith.constant dense<0.000000e+00> : vector<8x128xf32>
    %108 = tpu.matmul %106, %107, %cst_64 {dimension_numbers = #tpu.dot_dimension_numbers<[1], [0], [0], [1], [0, 0, 1, 1], [], []>} : vector<8x32xbf16>, vector<32x128xbf16>, vector<8x128xf32> -> vector<8x128xf32>
    %109 = arith.addf %105, %108 : vector<8x128xf32>
    %cst_65 = arith.constant 5.000000e-01 : f32
    %110 = vector.broadcast %cst_65 : f32 to vector<8x128xf32>
    %111 = arith.mulf %110, %109 : vector<8x128xf32>
    %112 = math.tanh %111 : vector<8x128xf32>
    %cst_66 = arith.constant 5.000000e-01 : f32
    %113 = vector.broadcast %cst_66 : f32 to vector<8x128xf32>
    %114 = arith.mulf %113, %112 : vector<8x128xf32>
    %cst_67 = arith.constant 5.000000e-01 : f32
    %115 = vector.broadcast %cst_67 : f32 to vector<8x128xf32>
    %116 = arith.addf %114, %115 : vector<8x128xf32>
    %117 = math.tanh %109 : vector<8x128xf32>
    %118 = vector.extract_strided_slice %116 {offsets = [0, 0], sizes = [8, 32], strides = [1, 1]} : vector<8x128xf32> to vector<8x32xf32>
    %119 = vector.extract_strided_slice %116 {offsets = [0, 32], sizes = [8, 32], strides = [1, 1]} : vector<8x128xf32> to vector<8x32xf32>
    %120 = vector.extract_strided_slice %117 {offsets = [0, 64], sizes = [8, 32], strides = [1, 1]} : vector<8x128xf32> to vector<8x32xf32>
    %121 = vector.extract_strided_slice %116 {offsets = [0, 96], sizes = [8, 32], strides = [1, 1]} : vector<8x128xf32> to vector<8x32xf32>
    %122 = arith.mulf %119, %102 : vector<8x32xf32>
    %123 = arith.mulf %118, %120 : vector<8x32xf32>
    %124 = arith.addf %122, %123 : vector<8x32xf32>
    %125 = math.tanh %124 : vector<8x32xf32>
    %126 = arith.mulf %121, %125 : vector<8x32xf32>
    %127 = arith.select %98, %126, %100 : vector<8x32xi1>, vector<8x32xf32>
    %128 = arith.select %98, %124, %102 : vector<8x32xi1>, vector<8x32xf32>
    %c0_68 = arith.constant 0 : index
    %c0_69 = arith.constant 0 : index
    %c0_70 = arith.constant 0 : index
    %129 = vector.load %arg12[%c0_68, %c0_69, %c0_70] : memref<2x8x32xf32, #tpu.memory_space<vmem>>, vector<1x8x32xf32>
    %130 = vector.shape_cast %129 : vector<1x8x32xf32> to vector<8x32xf32>
    %131 = vector.shape_cast %127 : vector<8x32xf32> to vector<1x8x32xf32>
    tpu.vector_store %arg12[%c0_68, %c0_69, %c0_70], %131 {strides = array<i32>} : memref<2x8x32xf32, #tpu.memory_space<vmem>>, vector<1x8x32xf32>,
    %c0_71 = arith.constant 0 : index
    %c0_72 = arith.constant 0 : index
    %c0_73 = arith.constant 0 : index
    %132 = vector.load %arg13[%c0_71, %c0_72, %c0_73] : memref<2x8x32xf32, #tpu.memory_space<vmem>>, vector<1x8x32xf32>
    %133 = vector.shape_cast %132 : vector<1x8x32xf32> to vector<8x32xf32>
    %134 = vector.shape_cast %128 : vector<8x32xf32> to vector<1x8x32xf32>
    tpu.vector_store %arg13[%c0_71, %c0_72, %c0_73], %134 {strides = array<i32>} : memref<2x8x32xf32, #tpu.memory_space<vmem>>, vector<1x8x32xf32>,
    %c1_74 = arith.constant 1 : index
    %c0_75 = arith.constant 0 : index
    %c0_76 = arith.constant 0 : index
    %135 = vector.load %arg12[%c1_74, %c0_75, %c0_76] : memref<2x8x32xf32, #tpu.memory_space<vmem>>, vector<1x8x32xf32>
    %136 = vector.shape_cast %135 : vector<1x8x32xf32> to vector<8x32xf32>
    %c1_77 = arith.constant 1 : index
    %c0_78 = arith.constant 0 : index
    %c0_79 = arith.constant 0 : index
    %137 = vector.load %arg13[%c1_77, %c0_78, %c0_79] : memref<2x8x32xf32, #tpu.memory_space<vmem>>, vector<1x8x32xf32>
    %138 = vector.shape_cast %137 : vector<1x8x32xf32> to vector<8x32xf32>
    %139 = tpu.concatenate %127, %136 in 1 : vector<8x32xf32>, vector<8x32xf32> -> vector<8x64xf32>
    %140 = arith.truncf %139 : vector<8x64xf32> to vector<8x64xbf16>
    %c0_80 = arith.constant 0 : index
    %c0_81 = arith.constant 0 : index
    %c0_82 = arith.constant 0 : index
    %141 = vector.load %arg7[%c0_80, %c0_81, %c0_82] : memref<1x64x128xbf16, #tpu.memory_space<vmem>>, vector<1x64x128xbf16>
    %142 = vector.shape_cast %141 : vector<1x64x128xbf16> to vector<64x128xbf16>
    %cst_83 = arith.constant dense<0.000000e+00> : vector<8x128xf32>
    %143 = tpu.matmul %140, %142, %cst_83 {dimension_numbers = #tpu.dot_dimension_numbers<[1], [0], [0], [1], [0, 0, 1, 1], [], []>} : vector<8x64xbf16>, vector<64x128xbf16>, vector<8x128xf32> -> vector<8x128xf32>
    %144 = arith.addf %143, %20 : vector<8x128xf32>
    %cst_84 = arith.constant 5.000000e-01 : f32
    %145 = vector.broadcast %cst_84 : f32 to vector<8x128xf32>
    %146 = arith.mulf %145, %144 : vector<8x128xf32>
    %147 = math.tanh %146 : vector<8x128xf32>
    %cst_85 = arith.constant 5.000000e-01 : f32
    %148 = vector.broadcast %cst_85 : f32 to vector<8x128xf32>
    %149 = arith.mulf %148, %147 : vector<8x128xf32>
    %cst_86 = arith.constant 5.000000e-01 : f32
    %150 = vector.broadcast %cst_86 : f32 to vector<8x128xf32>
    %151 = arith.addf %149, %150 : vector<8x128xf32>
    %152 = math.tanh %144 : vector<8x128xf32>
    %153 = vector.extract_strided_slice %151 {offsets = [0, 0], sizes = [8, 32], strides = [1, 1]} : vector<8x128xf32> to vector<8x32xf32>
    %154 = vector.extract_strided_slice %151 {offsets = [0, 32], sizes = [8, 32], strides = [1, 1]} : vector<8x128xf32> to vector<8x32xf32>
    %155 = vector.extract_strided_slice %152 {offsets = [0, 64], sizes = [8, 32], strides = [1, 1]} : vector<8x128xf32> to vector<8x32xf32>
    %156 = vector.extract_strided_slice %151 {offsets = [0, 96], sizes = [8, 32], strides = [1, 1]} : vector<8x128xf32> to vector<8x32xf32>
    %157 = arith.mulf %154, %138 : vector<8x32xf32>
    %158 = arith.mulf %153, %155 : vector<8x32xf32>
    %159 = arith.addf %157, %158 : vector<8x32xf32>
    %160 = math.tanh %159 : vector<8x32xf32>
    %161 = arith.mulf %156, %160 : vector<8x32xf32>
    %162 = arith.select %98, %161, %136 : vector<8x32xi1>, vector<8x32xf32>
    %163 = arith.select %98, %159, %138 : vector<8x32xi1>, vector<8x32xf32>
    %c1_87 = arith.constant 1 : index
    %c0_88 = arith.constant 0 : index
    %c0_89 = arith.constant 0 : index
    %164 = vector.load %arg12[%c1_87, %c0_88, %c0_89] : memref<2x8x32xf32, #tpu.memory_space<vmem>>, vector<1x8x32xf32>
    %165 = vector.shape_cast %164 : vector<1x8x32xf32> to vector<8x32xf32>
    %166 = vector.shape_cast %162 : vector<8x32xf32> to vector<1x8x32xf32>
    tpu.vector_store %arg12[%c1_87, %c0_88, %c0_89], %166 {strides = array<i32>} : memref<2x8x32xf32, #tpu.memory_space<vmem>>, vector<1x8x32xf32>,
    %c1_90 = arith.constant 1 : index
    %c0_91 = arith.constant 0 : index
    %c0_92 = arith.constant 0 : index
    %167 = vector.load %arg13[%c1_90, %c0_91, %c0_92] : memref<2x8x32xf32, #tpu.memory_space<vmem>>, vector<1x8x32xf32>
    %168 = vector.shape_cast %167 : vector<1x8x32xf32> to vector<8x32xf32>
    %169 = vector.shape_cast %163 : vector<8x32xf32> to vector<1x8x32xf32>
    tpu.vector_store %arg13[%c1_90, %c0_91, %c0_92], %169 {strides = array<i32>} : memref<2x8x32xf32, #tpu.memory_space<vmem>>, vector<1x8x32xf32>,
    %c2_i32 = arith.constant 2 : i32
    %170 = arith.addi %21, %c2_i32 : i32
    %171 = vector.broadcast %170 : i32 to vector<8x32xi32>
    %172 = arith.cmpi slt, %171, %16 : vector<8x32xi32>
    %c0_93 = arith.constant 0 : index
    %c0_94 = arith.constant 0 : index
    %c0_95 = arith.constant 0 : index
    %173 = vector.load %arg12[%c0_93, %c0_94, %c0_95] : memref<2x8x32xf32, #tpu.memory_space<vmem>>, vector<1x8x32xf32>
    %174 = vector.shape_cast %173 : vector<1x8x32xf32> to vector<8x32xf32>
    %c0_96 = arith.constant 0 : index
    %c0_97 = arith.constant 0 : index
    %c0_98 = arith.constant 0 : index
    %175 = vector.load %arg13[%c0_96, %c0_97, %c0_98] : memref<2x8x32xf32, #tpu.memory_space<vmem>>, vector<1x8x32xf32>
    %176 = vector.shape_cast %175 : vector<1x8x32xf32> to vector<8x32xf32>
    %177 = arith.index_cast %c2_i32 : i32 to index
    %c0_99 = arith.constant 0 : index
    %c0_100 = arith.constant 0 : index
    %178 = vector.load %arg14[%177, %c0_99, %c0_100] : memref<8x8x128xf32, #tpu.memory_space<vmem>>, vector<1x8x128xf32>
    %179 = vector.shape_cast %178 : vector<1x8x128xf32> to vector<8x128xf32>
    %180 = arith.truncf %174 : vector<8x32xf32> to vector<8x32xbf16>
    %c0_101 = arith.constant 0 : index
    %c0_102 = arith.constant 0 : index
    %181 = vector.load %arg6[%c0_101, %c0_102] : memref<32x128xbf16, #tpu.memory_space<vmem>>, vector<32x128xbf16>
    %cst_103 = arith.constant dense<0.000000e+00> : vector<8x128xf32>
    %182 = tpu.matmul %180, %181, %cst_103 {dimension_numbers = #tpu.dot_dimension_numbers<[1], [0], [0], [1], [0, 0, 1, 1], [], []>} : vector<8x32xbf16>, vector<32x128xbf16>, vector<8x128xf32> -> vector<8x128xf32>
    %183 = arith.addf %179, %182 : vector<8x128xf32>
    %cst_104 = arith.constant 5.000000e-01 : f32
    %184 = vector.broadcast %cst_104 : f32 to vector<8x128xf32>
    %185 = arith.mulf %184, %183 : vector<8x128xf32>
    %186 = math.tanh %185 : vector<8x128xf32>
    %cst_105 = arith.constant 5.000000e-01 : f32
    %187 = vector.broadcast %cst_105 : f32 to vector<8x128xf32>
    %188 = arith.mulf %187, %186 : vector<8x128xf32>
    %cst_106 = arith.constant 5.000000e-01 : f32
    %189 = vector.broadcast %cst_106 : f32 to vector<8x128xf32>
    %190 = arith.addf %188, %189 : vector<8x128xf32>
    %191 = math.tanh %183 : vector<8x128xf32>
    %192 = vector.extract_strided_slice %190 {offsets = [0, 0], sizes = [8, 32], strides = [1, 1]} : vector<8x128xf32> to vector<8x32xf32>
    %193 = vector.extract_strided_slice %190 {offsets = [0, 32], sizes = [8, 32], strides = [1, 1]} : vector<8x128xf32> to vector<8x32xf32>
    %194 = vector.extract_strided_slice %191 {offsets = [0, 64], sizes = [8, 32], strides = [1, 1]} : vector<8x128xf32> to vector<8x32xf32>
    %195 = vector.extract_strided_slice %190 {offsets = [0, 96], sizes = [8, 32], strides = [1, 1]} : vector<8x128xf32> to vector<8x32xf32>
    %196 = arith.mulf %193, %176 : vector<8x32xf32>
    %197 = arith.mulf %192, %194 : vector<8x32xf32>
    %198 = arith.addf %196, %197 : vector<8x32xf32>
    %199 = math.tanh %198 : vector<8x32xf32>
    %200 = arith.mulf %195, %199 : vector<8x32xf32>
    %201 = arith.select %172, %200, %174 : vector<8x32xi1>, vector<8x32xf32>
    %202 = arith.select %172, %198, %176 : vector<8x32xi1>, vector<8x32xf32>
    %c0_107 = arith.constant 0 : index
    %c0_108 = arith.constant 0 : index
    %c0_109 = arith.constant 0 : index
    %203 = vector.load %arg12[%c0_107, %c0_108, %c0_109] : memref<2x8x32xf32, #tpu.memory_space<vmem>>, vector<1x8x32xf32>
    %204 = vector.shape_cast %203 : vector<1x8x32xf32> to vector<8x32xf32>
    %205 = vector.shape_cast %201 : vector<8x32xf32> to vector<1x8x32xf32>
    tpu.vector_store %arg12[%c0_107, %c0_108, %c0_109], %205 {strides = array<i32>} : memref<2x8x32xf32, #tpu.memory_space<vmem>>, vector<1x8x32xf32>,
    %c0_110 = arith.constant 0 : index
    %c0_111 = arith.constant 0 : index
    %c0_112 = arith.constant 0 : index
    %206 = vector.load %arg13[%c0_110, %c0_111, %c0_112] : memref<2x8x32xf32, #tpu.memory_space<vmem>>, vector<1x8x32xf32>
    %207 = vector.shape_cast %206 : vector<1x8x32xf32> to vector<8x32xf32>
    %208 = vector.shape_cast %202 : vector<8x32xf32> to vector<1x8x32xf32>
    tpu.vector_store %arg13[%c0_110, %c0_111, %c0_112], %208 {strides = array<i32>} : memref<2x8x32xf32, #tpu.memory_space<vmem>>, vector<1x8x32xf32>,
    %c1_113 = arith.constant 1 : index
    %c0_114 = arith.constant 0 : index
    %c0_115 = arith.constant 0 : index
    %209 = vector.load %arg12[%c1_113, %c0_114, %c0_115] : memref<2x8x32xf32, #tpu.memory_space<vmem>>, vector<1x8x32xf32>
    %210 = vector.shape_cast %209 : vector<1x8x32xf32> to vector<8x32xf32>
    %c1_116 = arith.constant 1 : index
    %c0_117 = arith.constant 0 : index
    %c0_118 = arith.constant 0 : index
    %211 = vector.load %arg13[%c1_116, %c0_117, %c0_118] : memref<2x8x32xf32, #tpu.memory_space<vmem>>, vector<1x8x32xf32>
    %212 = vector.shape_cast %211 : vector<1x8x32xf32> to vector<8x32xf32>
    %213 = tpu.concatenate %201, %210 in 1 : vector<8x32xf32>, vector<8x32xf32> -> vector<8x64xf32>
    %214 = arith.truncf %213 : vector<8x64xf32> to vector<8x64xbf16>
    %c0_119 = arith.constant 0 : index
    %c0_120 = arith.constant 0 : index
    %c0_121 = arith.constant 0 : index
    %215 = vector.load %arg7[%c0_119, %c0_120, %c0_121] : memref<1x64x128xbf16, #tpu.memory_space<vmem>>, vector<1x64x128xbf16>
    %216 = vector.shape_cast %215 : vector<1x64x128xbf16> to vector<64x128xbf16>
    %cst_122 = arith.constant dense<0.000000e+00> : vector<8x128xf32>
    %217 = tpu.matmul %214, %216, %cst_122 {dimension_numbers = #tpu.dot_dimension_numbers<[1], [0], [0], [1], [0, 0, 1, 1], [], []>} : vector<8x64xbf16>, vector<64x128xbf16>, vector<8x128xf32> -> vector<8x128xf32>
    %218 = arith.addf %217, %20 : vector<8x128xf32>
    %cst_123 = arith.constant 5.000000e-01 : f32
    %219 = vector.broadcast %cst_123 : f32 to vector<8x128xf32>
    %220 = arith.mulf %219, %218 : vector<8x128xf32>
    %221 = math.tanh %220 : vector<8x128xf32>
    %cst_124 = arith.constant 5.000000e-01 : f32
    %222 = vector.broadcast %cst_124 : f32 to vector<8x128xf32>
    %223 = arith.mulf %222, %221 : vector<8x128xf32>
    %cst_125 = arith.constant 5.000000e-01 : f32
    %224 = vector.broadcast %cst_125 : f32 to vector<8x128xf32>
    %225 = arith.addf %223, %224 : vector<8x128xf32>
    %226 = math.tanh %218 : vector<8x128xf32>
    %227 = vector.extract_strided_slice %225 {offsets = [0, 0], sizes = [8, 32], strides = [1, 1]} : vector<8x128xf32> to vector<8x32xf32>
    %228 = vector.extract_strided_slice %225 {offsets = [0, 32], sizes = [8, 32], strides = [1, 1]} : vector<8x128xf32> to vector<8x32xf32>
    %229 = vector.extract_strided_slice %226 {offsets = [0, 64], sizes = [8, 32], strides = [1, 1]} : vector<8x128xf32> to vector<8x32xf32>
    %230 = vector.extract_strided_slice %225 {offsets = [0, 96], sizes = [8, 32], strides = [1, 1]} : vector<8x128xf32> to vector<8x32xf32>
    %231 = arith.mulf %228, %212 : vector<8x32xf32>
    %232 = arith.mulf %227, %229 : vector<8x32xf32>
    %233 = arith.addf %231, %232 : vector<8x32xf32>
    %234 = math.tanh %233 : vector<8x32xf32>
    %235 = arith.mulf %230, %234 : vector<8x32xf32>
    %236 = arith.select %172, %235, %210 : vector<8x32xi1>, vector<8x32xf32>
    %237 = arith.select %172, %233, %212 : vector<8x32xi1>, vector<8x32xf32>
    %c1_126 = arith.constant 1 : index
    %c0_127 = arith.constant 0 : index
    %c0_128 = arith.constant 0 : index
    %238 = vector.load %arg12[%c1_126, %c0_127, %c0_128] : memref<2x8x32xf32, #tpu.memory_space<vmem>>, vector<1x8x32xf32>
    %239 = vector.shape_cast %238 : vector<1x8x32xf32> to vector<8x32xf32>
    %240 = vector.shape_cast %236 : vector<8x32xf32> to vector<1x8x32xf32>
    tpu.vector_store %arg12[%c1_126, %c0_127, %c0_128], %240 {strides = array<i32>} : memref<2x8x32xf32, #tpu.memory_space<vmem>>, vector<1x8x32xf32>,
    %c1_129 = arith.constant 1 : index
    %c0_130 = arith.constant 0 : index
    %c0_131 = arith.constant 0 : index
    %241 = vector.load %arg13[%c1_129, %c0_130, %c0_131] : memref<2x8x32xf32, #tpu.memory_space<vmem>>, vector<1x8x32xf32>
    %242 = vector.shape_cast %241 : vector<1x8x32xf32> to vector<8x32xf32>
    %243 = vector.shape_cast %237 : vector<8x32xf32> to vector<1x8x32xf32>
    tpu.vector_store %arg13[%c1_129, %c0_130, %c0_131], %243 {strides = array<i32>} : memref<2x8x32xf32, #tpu.memory_space<vmem>>, vector<1x8x32xf32>,
    %c3_i32 = arith.constant 3 : i32
    %244 = arith.addi %21, %c3_i32 : i32
    %245 = vector.broadcast %244 : i32 to vector<8x32xi32>
    %246 = arith.cmpi slt, %245, %16 : vector<8x32xi32>
    %c0_132 = arith.constant 0 : index
    %c0_133 = arith.constant 0 : index
    %c0_134 = arith.constant 0 : index
    %247 = vector.load %arg12[%c0_132, %c0_133, %c0_134] : memref<2x8x32xf32, #tpu.memory_space<vmem>>, vector<1x8x32xf32>
    %248 = vector.shape_cast %247 : vector<1x8x32xf32> to vector<8x32xf32>
    %c0_135 = arith.constant 0 : index
    %c0_136 = arith.constant 0 : index
    %c0_137 = arith.constant 0 : index
    %249 = vector.load %arg13[%c0_135, %c0_136, %c0_137] : memref<2x8x32xf32, #tpu.memory_space<vmem>>, vector<1x8x32xf32>
    %250 = vector.shape_cast %249 : vector<1x8x32xf32> to vector<8x32xf32>
    %251 = arith.index_cast %c3_i32 : i32 to index
    %c0_138 = arith.constant 0 : index
    %c0_139 = arith.constant 0 : index
    %252 = vector.load %arg14[%251, %c0_138, %c0_139] : memref<8x8x128xf32, #tpu.memory_space<vmem>>, vector<1x8x128xf32>
    %253 = vector.shape_cast %252 : vector<1x8x128xf32> to vector<8x128xf32>
    %254 = arith.truncf %248 : vector<8x32xf32> to vector<8x32xbf16>
    %c0_140 = arith.constant 0 : index
    %c0_141 = arith.constant 0 : index
    %255 = vector.load %arg6[%c0_140, %c0_141] : memref<32x128xbf16, #tpu.memory_space<vmem>>, vector<32x128xbf16>
    %cst_142 = arith.constant dense<0.000000e+00> : vector<8x128xf32>
    %256 = tpu.matmul %254, %255, %cst_142 {dimension_numbers = #tpu.dot_dimension_numbers<[1], [0], [0], [1], [0, 0, 1, 1], [], []>} : vector<8x32xbf16>, vector<32x128xbf16>, vector<8x128xf32> -> vector<8x128xf32>
    %257 = arith.addf %253, %256 : vector<8x128xf32>
    %cst_143 = arith.constant 5.000000e-01 : f32
    %258 = vector.broadcast %cst_143 : f32 to vector<8x128xf32>
    %259 = arith.mulf %258, %257 : vector<8x128xf32>
    %260 = math.tanh %259 : vector<8x128xf32>
    %cst_144 = arith.constant 5.000000e-01 : f32
    %261 = vector.broadcast %cst_144 : f32 to vector<8x128xf32>
    %262 = arith.mulf %261, %260 : vector<8x128xf32>
    %cst_145 = arith.constant 5.000000e-01 : f32
    %263 = vector.broadcast %cst_145 : f32 to vector<8x128xf32>
    %264 = arith.addf %262, %263 : vector<8x128xf32>
    %265 = math.tanh %257 : vector<8x128xf32>
    %266 = vector.extract_strided_slice %264 {offsets = [0, 0], sizes = [8, 32], strides = [1, 1]} : vector<8x128xf32> to vector<8x32xf32>
    %267 = vector.extract_strided_slice %264 {offsets = [0, 32], sizes = [8, 32], strides = [1, 1]} : vector<8x128xf32> to vector<8x32xf32>
    %268 = vector.extract_strided_slice %265 {offsets = [0, 64], sizes = [8, 32], strides = [1, 1]} : vector<8x128xf32> to vector<8x32xf32>
    %269 = vector.extract_strided_slice %264 {offsets = [0, 96], sizes = [8, 32], strides = [1, 1]} : vector<8x128xf32> to vector<8x32xf32>
    %270 = arith.mulf %267, %250 : vector<8x32xf32>
    %271 = arith.mulf %266, %268 : vector<8x32xf32>
    %272 = arith.addf %270, %271 : vector<8x32xf32>
    %273 = math.tanh %272 : vector<8x32xf32>
    %274 = arith.mulf %269, %273 : vector<8x32xf32>
    %275 = arith.select %246, %274, %248 : vector<8x32xi1>, vector<8x32xf32>
    %276 = arith.select %246, %272, %250 : vector<8x32xi1>, vector<8x32xf32>
    %c0_146 = arith.constant 0 : index
    %c0_147 = arith.constant 0 : index
    %c0_148 = arith.constant 0 : index
    %277 = vector.load %arg12[%c0_146, %c0_147, %c0_148] : memref<2x8x32xf32, #tpu.memory_space<vmem>>, vector<1x8x32xf32>
    %278 = vector.shape_cast %277 : vector<1x8x32xf32> to vector<8x32xf32>
    %279 = vector.shape_cast %275 : vector<8x32xf32> to vector<1x8x32xf32>
    tpu.vector_store %arg12[%c0_146, %c0_147, %c0_148], %279 {strides = array<i32>} : memref<2x8x32xf32, #tpu.memory_space<vmem>>, vector<1x8x32xf32>,
    %c0_149 = arith.constant 0 : index
    %c0_150 = arith.constant 0 : index
    %c0_151 = arith.constant 0 : index
    %280 = vector.load %arg13[%c0_149, %c0_150, %c0_151] : memref<2x8x32xf32, #tpu.memory_space<vmem>>, vector<1x8x32xf32>
    %281 = vector.shape_cast %280 : vector<1x8x32xf32> to vector<8x32xf32>
    %282 = vector.shape_cast %276 : vector<8x32xf32> to vector<1x8x32xf32>
    tpu.vector_store %arg13[%c0_149, %c0_150, %c0_151], %282 {strides = array<i32>} : memref<2x8x32xf32, #tpu.memory_space<vmem>>, vector<1x8x32xf32>,
    %c1_152 = arith.constant 1 : index
    %c0_153 = arith.constant 0 : index
    %c0_154 = arith.constant 0 : index
    %283 = vector.load %arg12[%c1_152, %c0_153, %c0_154] : memref<2x8x32xf32, #tpu.memory_space<vmem>>, vector<1x8x32xf32>
    %284 = vector.shape_cast %283 : vector<1x8x32xf32> to vector<8x32xf32>
    %c1_155 = arith.constant 1 : index
    %c0_156 = arith.constant 0 : index
    %c0_157 = arith.constant 0 : index
    %285 = vector.load %arg13[%c1_155, %c0_156, %c0_157] : memref<2x8x32xf32, #tpu.memory_space<vmem>>, vector<1x8x32xf32>
    %286 = vector.shape_cast %285 : vector<1x8x32xf32> to vector<8x32xf32>
    %287 = tpu.concatenate %275, %284 in 1 : vector<8x32xf32>, vector<8x32xf32> -> vector<8x64xf32>
    %288 = arith.truncf %287 : vector<8x64xf32> to vector<8x64xbf16>
    %c0_158 = arith.constant 0 : index
    %c0_159 = arith.constant 0 : index
    %c0_160 = arith.constant 0 : index
    %289 = vector.load %arg7[%c0_158, %c0_159, %c0_160] : memref<1x64x128xbf16, #tpu.memory_space<vmem>>, vector<1x64x128xbf16>
    %290 = vector.shape_cast %289 : vector<1x64x128xbf16> to vector<64x128xbf16>
    %cst_161 = arith.constant dense<0.000000e+00> : vector<8x128xf32>
    %291 = tpu.matmul %288, %290, %cst_161 {dimension_numbers = #tpu.dot_dimension_numbers<[1], [0], [0], [1], [0, 0, 1, 1], [], []>} : vector<8x64xbf16>, vector<64x128xbf16>, vector<8x128xf32> -> vector<8x128xf32>
    %292 = arith.addf %291, %20 : vector<8x128xf32>
    %cst_162 = arith.constant 5.000000e-01 : f32
    %293 = vector.broadcast %cst_162 : f32 to vector<8x128xf32>
    %294 = arith.mulf %293, %292 : vector<8x128xf32>
    %295 = math.tanh %294 : vector<8x128xf32>
    %cst_163 = arith.constant 5.000000e-01 : f32
    %296 = vector.broadcast %cst_163 : f32 to vector<8x128xf32>
    %297 = arith.mulf %296, %295 : vector<8x128xf32>
    %cst_164 = arith.constant 5.000000e-01 : f32
    %298 = vector.broadcast %cst_164 : f32 to vector<8x128xf32>
    %299 = arith.addf %297, %298 : vector<8x128xf32>
    %300 = math.tanh %292 : vector<8x128xf32>
    %301 = vector.extract_strided_slice %299 {offsets = [0, 0], sizes = [8, 32], strides = [1, 1]} : vector<8x128xf32> to vector<8x32xf32>
    %302 = vector.extract_strided_slice %299 {offsets = [0, 32], sizes = [8, 32], strides = [1, 1]} : vector<8x128xf32> to vector<8x32xf32>
    %303 = vector.extract_strided_slice %300 {offsets = [0, 64], sizes = [8, 32], strides = [1, 1]} : vector<8x128xf32> to vector<8x32xf32>
    %304 = vector.extract_strided_slice %299 {offsets = [0, 96], sizes = [8, 32], strides = [1, 1]} : vector<8x128xf32> to vector<8x32xf32>
    %305 = arith.mulf %302, %286 : vector<8x32xf32>
    %306 = arith.mulf %301, %303 : vector<8x32xf32>
    %307 = arith.addf %305, %306 : vector<8x32xf32>
    %308 = math.tanh %307 : vector<8x32xf32>
    %309 = arith.mulf %304, %308 : vector<8x32xf32>
    %310 = arith.select %246, %309, %284 : vector<8x32xi1>, vector<8x32xf32>
    %311 = arith.select %246, %307, %286 : vector<8x32xi1>, vector<8x32xf32>
    %c1_165 = arith.constant 1 : index
    %c0_166 = arith.constant 0 : index
    %c0_167 = arith.constant 0 : index
    %312 = vector.load %arg12[%c1_165, %c0_166, %c0_167] : memref<2x8x32xf32, #tpu.memory_space<vmem>>, vector<1x8x32xf32>
    %313 = vector.shape_cast %312 : vector<1x8x32xf32> to vector<8x32xf32>
    %314 = vector.shape_cast %310 : vector<8x32xf32> to vector<1x8x32xf32>
    tpu.vector_store %arg12[%c1_165, %c0_166, %c0_167], %314 {strides = array<i32>} : memref<2x8x32xf32, #tpu.memory_space<vmem>>, vector<1x8x32xf32>,
    %c1_168 = arith.constant 1 : index
    %c0_169 = arith.constant 0 : index
    %c0_170 = arith.constant 0 : index
    %315 = vector.load %arg13[%c1_168, %c0_169, %c0_170] : memref<2x8x32xf32, #tpu.memory_space<vmem>>, vector<1x8x32xf32>
    %316 = vector.shape_cast %315 : vector<1x8x32xf32> to vector<8x32xf32>
    %317 = vector.shape_cast %311 : vector<8x32xf32> to vector<1x8x32xf32>
    tpu.vector_store %arg13[%c1_168, %c0_169, %c0_170], %317 {strides = array<i32>} : memref<2x8x32xf32, #tpu.memory_space<vmem>>, vector<1x8x32xf32>,
    %c4_i32 = arith.constant 4 : i32
    %318 = arith.addi %21, %c4_i32 : i32
    %319 = vector.broadcast %318 : i32 to vector<8x32xi32>
    %320 = arith.cmpi slt, %319, %16 : vector<8x32xi32>
    %c0_171 = arith.constant 0 : index
    %c0_172 = arith.constant 0 : index
    %c0_173 = arith.constant 0 : index
    %321 = vector.load %arg12[%c0_171, %c0_172, %c0_173] : memref<2x8x32xf32, #tpu.memory_space<vmem>>, vector<1x8x32xf32>
    %322 = vector.shape_cast %321 : vector<1x8x32xf32> to vector<8x32xf32>
    %c0_174 = arith.constant 0 : index
    %c0_175 = arith.constant 0 : index
    %c0_176 = arith.constant 0 : index
    %323 = vector.load %arg13[%c0_174, %c0_175, %c0_176] : memref<2x8x32xf32, #tpu.memory_space<vmem>>, vector<1x8x32xf32>
    %324 = vector.shape_cast %323 : vector<1x8x32xf32> to vector<8x32xf32>
    %325 = arith.index_cast %c4_i32 : i32 to index
    %c0_177 = arith.constant 0 : index
    %c0_178 = arith.constant 0 : index
    %326 = vector.load %arg14[%325, %c0_177, %c0_178] : memref<8x8x128xf32, #tpu.memory_space<vmem>>, vector<1x8x128xf32>
    %327 = vector.shape_cast %326 : vector<1x8x128xf32> to vector<8x128xf32>
    %328 = arith.truncf %322 : vector<8x32xf32> to vector<8x32xbf16>
    %c0_179 = arith.constant 0 : index
    %c0_180 = arith.constant 0 : index
    %329 = vector.load %arg6[%c0_179, %c0_180] : memref<32x128xbf16, #tpu.memory_space<vmem>>, vector<32x128xbf16>
    %cst_181 = arith.constant dense<0.000000e+00> : vector<8x128xf32>
    %330 = tpu.matmul %328, %329, %cst_181 {dimension_numbers = #tpu.dot_dimension_numbers<[1], [0], [0], [1], [0, 0, 1, 1], [], []>} : vector<8x32xbf16>, vector<32x128xbf16>, vector<8x128xf32> -> vector<8x128xf32>
    %331 = arith.addf %327, %330 : vector<8x128xf32>
    %cst_182 = arith.constant 5.000000e-01 : f32
    %332 = vector.broadcast %cst_182 : f32 to vector<8x128xf32>
    %333 = arith.mulf %332, %331 : vector<8x128xf32>
    %334 = math.tanh %333 : vector<8x128xf32>
    %cst_183 = arith.constant 5.000000e-01 : f32
    %335 = vector.broadcast %cst_183 : f32 to vector<8x128xf32>
    %336 = arith.mulf %335, %334 : vector<8x128xf32>
    %cst_184 = arith.constant 5.000000e-01 : f32
    %337 = vector.broadcast %cst_184 : f32 to vector<8x128xf32>
    %338 = arith.addf %336, %337 : vector<8x128xf32>
    %339 = math.tanh %331 : vector<8x128xf32>
    %340 = vector.extract_strided_slice %338 {offsets = [0, 0], sizes = [8, 32], strides = [1, 1]} : vector<8x128xf32> to vector<8x32xf32>
    %341 = vector.extract_strided_slice %338 {offsets = [0, 32], sizes = [8, 32], strides = [1, 1]} : vector<8x128xf32> to vector<8x32xf32>
    %342 = vector.extract_strided_slice %339 {offsets = [0, 64], sizes = [8, 32], strides = [1, 1]} : vector<8x128xf32> to vector<8x32xf32>
    %343 = vector.extract_strided_slice %338 {offsets = [0, 96], sizes = [8, 32], strides = [1, 1]} : vector<8x128xf32> to vector<8x32xf32>
    %344 = arith.mulf %341, %324 : vector<8x32xf32>
    %345 = arith.mulf %340, %342 : vector<8x32xf32>
    %346 = arith.addf %344, %345 : vector<8x32xf32>
    %347 = math.tanh %346 : vector<8x32xf32>
    %348 = arith.mulf %343, %347 : vector<8x32xf32>
    %349 = arith.select %320, %348, %322 : vector<8x32xi1>, vector<8x32xf32>
    %350 = arith.select %320, %346, %324 : vector<8x32xi1>, vector<8x32xf32>
    %c0_185 = arith.constant 0 : index
    %c0_186 = arith.constant 0 : index
    %c0_187 = arith.constant 0 : index
    %351 = vector.load %arg12[%c0_185, %c0_186, %c0_187] : memref<2x8x32xf32, #tpu.memory_space<vmem>>, vector<1x8x32xf32>
    %352 = vector.shape_cast %351 : vector<1x8x32xf32> to vector<8x32xf32>
    %353 = vector.shape_cast %349 : vector<8x32xf32> to vector<1x8x32xf32>
    tpu.vector_store %arg12[%c0_185, %c0_186, %c0_187], %353 {strides = array<i32>} : memref<2x8x32xf32, #tpu.memory_space<vmem>>, vector<1x8x32xf32>,
    %c0_188 = arith.constant 0 : index
    %c0_189 = arith.constant 0 : index
    %c0_190 = arith.constant 0 : index
    %354 = vector.load %arg13[%c0_188, %c0_189, %c0_190] : memref<2x8x32xf32, #tpu.memory_space<vmem>>, vector<1x8x32xf32>
    %355 = vector.shape_cast %354 : vector<1x8x32xf32> to vector<8x32xf32>
    %356 = vector.shape_cast %350 : vector<8x32xf32> to vector<1x8x32xf32>
    tpu.vector_store %arg13[%c0_188, %c0_189, %c0_190], %356 {strides = array<i32>} : memref<2x8x32xf32, #tpu.memory_space<vmem>>, vector<1x8x32xf32>,
    %c1_191 = arith.constant 1 : index
    %c0_192 = arith.constant 0 : index
    %c0_193 = arith.constant 0 : index
    %357 = vector.load %arg12[%c1_191, %c0_192, %c0_193] : memref<2x8x32xf32, #tpu.memory_space<vmem>>, vector<1x8x32xf32>
    %358 = vector.shape_cast %357 : vector<1x8x32xf32> to vector<8x32xf32>
    %c1_194 = arith.constant 1 : index
    %c0_195 = arith.constant 0 : index
    %c0_196 = arith.constant 0 : index
    %359 = vector.load %arg13[%c1_194, %c0_195, %c0_196] : memref<2x8x32xf32, #tpu.memory_space<vmem>>, vector<1x8x32xf32>
    %360 = vector.shape_cast %359 : vector<1x8x32xf32> to vector<8x32xf32>
    %361 = tpu.concatenate %349, %358 in 1 : vector<8x32xf32>, vector<8x32xf32> -> vector<8x64xf32>
    %362 = arith.truncf %361 : vector<8x64xf32> to vector<8x64xbf16>
    %c0_197 = arith.constant 0 : index
    %c0_198 = arith.constant 0 : index
    %c0_199 = arith.constant 0 : index
    %363 = vector.load %arg7[%c0_197, %c0_198, %c0_199] : memref<1x64x128xbf16, #tpu.memory_space<vmem>>, vector<1x64x128xbf16>
    %364 = vector.shape_cast %363 : vector<1x64x128xbf16> to vector<64x128xbf16>
    %cst_200 = arith.constant dense<0.000000e+00> : vector<8x128xf32>
    %365 = tpu.matmul %362, %364, %cst_200 {dimension_numbers = #tpu.dot_dimension_numbers<[1], [0], [0], [1], [0, 0, 1, 1], [], []>} : vector<8x64xbf16>, vector<64x128xbf16>, vector<8x128xf32> -> vector<8x128xf32>
    %366 = arith.addf %365, %20 : vector<8x128xf32>
    %cst_201 = arith.constant 5.000000e-01 : f32
    %367 = vector.broadcast %cst_201 : f32 to vector<8x128xf32>
    %368 = arith.mulf %367, %366 : vector<8x128xf32>
    %369 = math.tanh %368 : vector<8x128xf32>
    %cst_202 = arith.constant 5.000000e-01 : f32
    %370 = vector.broadcast %cst_202 : f32 to vector<8x128xf32>
    %371 = arith.mulf %370, %369 : vector<8x128xf32>
    %cst_203 = arith.constant 5.000000e-01 : f32
    %372 = vector.broadcast %cst_203 : f32 to vector<8x128xf32>
    %373 = arith.addf %371, %372 : vector<8x128xf32>
    %374 = math.tanh %366 : vector<8x128xf32>
    %375 = vector.extract_strided_slice %373 {offsets = [0, 0], sizes = [8, 32], strides = [1, 1]} : vector<8x128xf32> to vector<8x32xf32>
    %376 = vector.extract_strided_slice %373 {offsets = [0, 32], sizes = [8, 32], strides = [1, 1]} : vector<8x128xf32> to vector<8x32xf32>
    %377 = vector.extract_strided_slice %374 {offsets = [0, 64], sizes = [8, 32], strides = [1, 1]} : vector<8x128xf32> to vector<8x32xf32>
    %378 = vector.extract_strided_slice %373 {offsets = [0, 96], sizes = [8, 32], strides = [1, 1]} : vector<8x128xf32> to vector<8x32xf32>
    %379 = arith.mulf %376, %360 : vector<8x32xf32>
    %380 = arith.mulf %375, %377 : vector<8x32xf32>
    %381 = arith.addf %379, %380 : vector<8x32xf32>
    %382 = math.tanh %381 : vector<8x32xf32>
    %383 = arith.mulf %378, %382 : vector<8x32xf32>
    %384 = arith.select %320, %383, %358 : vector<8x32xi1>, vector<8x32xf32>
    %385 = arith.select %320, %381, %360 : vector<8x32xi1>, vector<8x32xf32>
    %c1_204 = arith.constant 1 : index
    %c0_205 = arith.constant 0 : index
    %c0_206 = arith.constant 0 : index
    %386 = vector.load %arg12[%c1_204, %c0_205, %c0_206] : memref<2x8x32xf32, #tpu.memory_space<vmem>>, vector<1x8x32xf32>
    %387 = vector.shape_cast %386 : vector<1x8x32xf32> to vector<8x32xf32>
    %388 = vector.shape_cast %384 : vector<8x32xf32> to vector<1x8x32xf32>
    tpu.vector_store %arg12[%c1_204, %c0_205, %c0_206], %388 {strides = array<i32>} : memref<2x8x32xf32, #tpu.memory_space<vmem>>, vector<1x8x32xf32>,
    %c1_207 = arith.constant 1 : index
    %c0_208 = arith.constant 0 : index
    %c0_209 = arith.constant 0 : index
    %389 = vector.load %arg13[%c1_207, %c0_208, %c0_209] : memref<2x8x32xf32, #tpu.memory_space<vmem>>, vector<1x8x32xf32>
    %390 = vector.shape_cast %389 : vector<1x8x32xf32> to vector<8x32xf32>
    %391 = vector.shape_cast %385 : vector<8x32xf32> to vector<1x8x32xf32>
    tpu.vector_store %arg13[%c1_207, %c0_208, %c0_209], %391 {strides = array<i32>} : memref<2x8x32xf32, #tpu.memory_space<vmem>>, vector<1x8x32xf32>,
    %c5_i32 = arith.constant 5 : i32
    %392 = arith.addi %21, %c5_i32 : i32
    %393 = vector.broadcast %392 : i32 to vector<8x32xi32>
    %394 = arith.cmpi slt, %393, %16 : vector<8x32xi32>
    %c0_210 = arith.constant 0 : index
    %c0_211 = arith.constant 0 : index
    %c0_212 = arith.constant 0 : index
    %395 = vector.load %arg12[%c0_210, %c0_211, %c0_212] : memref<2x8x32xf32, #tpu.memory_space<vmem>>, vector<1x8x32xf32>
    %396 = vector.shape_cast %395 : vector<1x8x32xf32> to vector<8x32xf32>
    %c0_213 = arith.constant 0 : index
    %c0_214 = arith.constant 0 : index
    %c0_215 = arith.constant 0 : index
    %397 = vector.load %arg13[%c0_213, %c0_214, %c0_215] : memref<2x8x32xf32, #tpu.memory_space<vmem>>, vector<1x8x32xf32>
    %398 = vector.shape_cast %397 : vector<1x8x32xf32> to vector<8x32xf32>
    %399 = arith.index_cast %c5_i32 : i32 to index
    %c0_216 = arith.constant 0 : index
    %c0_217 = arith.constant 0 : index
    %400 = vector.load %arg14[%399, %c0_216, %c0_217] : memref<8x8x128xf32, #tpu.memory_space<vmem>>, vector<1x8x128xf32>
    %401 = vector.shape_cast %400 : vector<1x8x128xf32> to vector<8x128xf32>
    %402 = arith.truncf %396 : vector<8x32xf32> to vector<8x32xbf16>
    %c0_218 = arith.constant 0 : index
    %c0_219 = arith.constant 0 : index
    %403 = vector.load %arg6[%c0_218, %c0_219] : memref<32x128xbf16, #tpu.memory_space<vmem>>, vector<32x128xbf16>
    %cst_220 = arith.constant dense<0.000000e+00> : vector<8x128xf32>
    %404 = tpu.matmul %402, %403, %cst_220 {dimension_numbers = #tpu.dot_dimension_numbers<[1], [0], [0], [1], [0, 0, 1, 1], [], []>} : vector<8x32xbf16>, vector<32x128xbf16>, vector<8x128xf32> -> vector<8x128xf32>
    %405 = arith.addf %401, %404 : vector<8x128xf32>
    %cst_221 = arith.constant 5.000000e-01 : f32
    %406 = vector.broadcast %cst_221 : f32 to vector<8x128xf32>
    %407 = arith.mulf %406, %405 : vector<8x128xf32>
    %408 = math.tanh %407 : vector<8x128xf32>
    %cst_222 = arith.constant 5.000000e-01 : f32
    %409 = vector.broadcast %cst_222 : f32 to vector<8x128xf32>
    %410 = arith.mulf %409, %408 : vector<8x128xf32>
    %cst_223 = arith.constant 5.000000e-01 : f32
    %411 = vector.broadcast %cst_223 : f32 to vector<8x128xf32>
    %412 = arith.addf %410, %411 : vector<8x128xf32>
    %413 = math.tanh %405 : vector<8x128xf32>
    %414 = vector.extract_strided_slice %412 {offsets = [0, 0], sizes = [8, 32], strides = [1, 1]} : vector<8x128xf32> to vector<8x32xf32>
    %415 = vector.extract_strided_slice %412 {offsets = [0, 32], sizes = [8, 32], strides = [1, 1]} : vector<8x128xf32> to vector<8x32xf32>
    %416 = vector.extract_strided_slice %413 {offsets = [0, 64], sizes = [8, 32], strides = [1, 1]} : vector<8x128xf32> to vector<8x32xf32>
    %417 = vector.extract_strided_slice %412 {offsets = [0, 96], sizes = [8, 32], strides = [1, 1]} : vector<8x128xf32> to vector<8x32xf32>
    %418 = arith.mulf %415, %398 : vector<8x32xf32>
    %419 = arith.mulf %414, %416 : vector<8x32xf32>
    %420 = arith.addf %418, %419 : vector<8x32xf32>
    %421 = math.tanh %420 : vector<8x32xf32>
    %422 = arith.mulf %417, %421 : vector<8x32xf32>
    %423 = arith.select %394, %422, %396 : vector<8x32xi1>, vector<8x32xf32>
    %424 = arith.select %394, %420, %398 : vector<8x32xi1>, vector<8x32xf32>
    %c0_224 = arith.constant 0 : index
    %c0_225 = arith.constant 0 : index
    %c0_226 = arith.constant 0 : index
    %425 = vector.load %arg12[%c0_224, %c0_225, %c0_226] : memref<2x8x32xf32, #tpu.memory_space<vmem>>, vector<1x8x32xf32>
    %426 = vector.shape_cast %425 : vector<1x8x32xf32> to vector<8x32xf32>
    %427 = vector.shape_cast %423 : vector<8x32xf32> to vector<1x8x32xf32>
    tpu.vector_store %arg12[%c0_224, %c0_225, %c0_226], %427 {strides = array<i32>} : memref<2x8x32xf32, #tpu.memory_space<vmem>>, vector<1x8x32xf32>,
    %c0_227 = arith.constant 0 : index
    %c0_228 = arith.constant 0 : index
    %c0_229 = arith.constant 0 : index
    %428 = vector.load %arg13[%c0_227, %c0_228, %c0_229] : memref<2x8x32xf32, #tpu.memory_space<vmem>>, vector<1x8x32xf32>
    %429 = vector.shape_cast %428 : vector<1x8x32xf32> to vector<8x32xf32>
    %430 = vector.shape_cast %424 : vector<8x32xf32> to vector<1x8x32xf32>
    tpu.vector_store %arg13[%c0_227, %c0_228, %c0_229], %430 {strides = array<i32>} : memref<2x8x32xf32, #tpu.memory_space<vmem>>, vector<1x8x32xf32>,
    %c1_230 = arith.constant 1 : index
    %c0_231 = arith.constant 0 : index
    %c0_232 = arith.constant 0 : index
    %431 = vector.load %arg12[%c1_230, %c0_231, %c0_232] : memref<2x8x32xf32, #tpu.memory_space<vmem>>, vector<1x8x32xf32>
    %432 = vector.shape_cast %431 : vector<1x8x32xf32> to vector<8x32xf32>
    %c1_233 = arith.constant 1 : index
    %c0_234 = arith.constant 0 : index
    %c0_235 = arith.constant 0 : index
    %433 = vector.load %arg13[%c1_233, %c0_234, %c0_235] : memref<2x8x32xf32, #tpu.memory_space<vmem>>, vector<1x8x32xf32>
    %434 = vector.shape_cast %433 : vector<1x8x32xf32> to vector<8x32xf32>
    %435 = tpu.concatenate %423, %432 in 1 : vector<8x32xf32>, vector<8x32xf32> -> vector<8x64xf32>
    %436 = arith.truncf %435 : vector<8x64xf32> to vector<8x64xbf16>
    %c0_236 = arith.constant 0 : index
    %c0_237 = arith.constant 0 : index
    %c0_238 = arith.constant 0 : index
    %437 = vector.load %arg7[%c0_236, %c0_237, %c0_238] : memref<1x64x128xbf16, #tpu.memory_space<vmem>>, vector<1x64x128xbf16>
    %438 = vector.shape_cast %437 : vector<1x64x128xbf16> to vector<64x128xbf16>
    %cst_239 = arith.constant dense<0.000000e+00> : vector<8x128xf32>
    %439 = tpu.matmul %436, %438, %cst_239 {dimension_numbers = #tpu.dot_dimension_numbers<[1], [0], [0], [1], [0, 0, 1, 1], [], []>} : vector<8x64xbf16>, vector<64x128xbf16>, vector<8x128xf32> -> vector<8x128xf32>
    %440 = arith.addf %439, %20 : vector<8x128xf32>
    %cst_240 = arith.constant 5.000000e-01 : f32
    %441 = vector.broadcast %cst_240 : f32 to vector<8x128xf32>
    %442 = arith.mulf %441, %440 : vector<8x128xf32>
    %443 = math.tanh %442 : vector<8x128xf32>
    %cst_241 = arith.constant 5.000000e-01 : f32
    %444 = vector.broadcast %cst_241 : f32 to vector<8x128xf32>
    %445 = arith.mulf %444, %443 : vector<8x128xf32>
    %cst_242 = arith.constant 5.000000e-01 : f32
    %446 = vector.broadcast %cst_242 : f32 to vector<8x128xf32>
    %447 = arith.addf %445, %446 : vector<8x128xf32>
    %448 = math.tanh %440 : vector<8x128xf32>
    %449 = vector.extract_strided_slice %447 {offsets = [0, 0], sizes = [8, 32], strides = [1, 1]} : vector<8x128xf32> to vector<8x32xf32>
    %450 = vector.extract_strided_slice %447 {offsets = [0, 32], sizes = [8, 32], strides = [1, 1]} : vector<8x128xf32> to vector<8x32xf32>
    %451 = vector.extract_strided_slice %448 {offsets = [0, 64], sizes = [8, 32], strides = [1, 1]} : vector<8x128xf32> to vector<8x32xf32>
    %452 = vector.extract_strided_slice %447 {offsets = [0, 96], sizes = [8, 32], strides = [1, 1]} : vector<8x128xf32> to vector<8x32xf32>
    %453 = arith.mulf %450, %434 : vector<8x32xf32>
    %454 = arith.mulf %449, %451 : vector<8x32xf32>
    %455 = arith.addf %453, %454 : vector<8x32xf32>
    %456 = math.tanh %455 : vector<8x32xf32>
    %457 = arith.mulf %452, %456 : vector<8x32xf32>
    %458 = arith.select %394, %457, %432 : vector<8x32xi1>, vector<8x32xf32>
    %459 = arith.select %394, %455, %434 : vector<8x32xi1>, vector<8x32xf32>
    %c1_243 = arith.constant 1 : index
    %c0_244 = arith.constant 0 : index
    %c0_245 = arith.constant 0 : index
    %460 = vector.load %arg12[%c1_243, %c0_244, %c0_245] : memref<2x8x32xf32, #tpu.memory_space<vmem>>, vector<1x8x32xf32>
    %461 = vector.shape_cast %460 : vector<1x8x32xf32> to vector<8x32xf32>
    %462 = vector.shape_cast %458 : vector<8x32xf32> to vector<1x8x32xf32>
    tpu.vector_store %arg12[%c1_243, %c0_244, %c0_245], %462 {strides = array<i32>} : memref<2x8x32xf32, #tpu.memory_space<vmem>>, vector<1x8x32xf32>,
    %c1_246 = arith.constant 1 : index
    %c0_247 = arith.constant 0 : index
    %c0_248 = arith.constant 0 : index
    %463 = vector.load %arg13[%c1_246, %c0_247, %c0_248] : memref<2x8x32xf32, #tpu.memory_space<vmem>>, vector<1x8x32xf32>
    %464 = vector.shape_cast %463 : vector<1x8x32xf32> to vector<8x32xf32>
    %465 = vector.shape_cast %459 : vector<8x32xf32> to vector<1x8x32xf32>
    tpu.vector_store %arg13[%c1_246, %c0_247, %c0_248], %465 {strides = array<i32>} : memref<2x8x32xf32, #tpu.memory_space<vmem>>, vector<1x8x32xf32>,
    %c6_i32 = arith.constant 6 : i32
    %466 = arith.addi %21, %c6_i32 : i32
    %467 = vector.broadcast %466 : i32 to vector<8x32xi32>
    %468 = arith.cmpi slt, %467, %16 : vector<8x32xi32>
    %c0_249 = arith.constant 0 : index
    %c0_250 = arith.constant 0 : index
    %c0_251 = arith.constant 0 : index
    %469 = vector.load %arg12[%c0_249, %c0_250, %c0_251] : memref<2x8x32xf32, #tpu.memory_space<vmem>>, vector<1x8x32xf32>
    %470 = vector.shape_cast %469 : vector<1x8x32xf32> to vector<8x32xf32>
    %c0_252 = arith.constant 0 : index
    %c0_253 = arith.constant 0 : index
    %c0_254 = arith.constant 0 : index
    %471 = vector.load %arg13[%c0_252, %c0_253, %c0_254] : memref<2x8x32xf32, #tpu.memory_space<vmem>>, vector<1x8x32xf32>
    %472 = vector.shape_cast %471 : vector<1x8x32xf32> to vector<8x32xf32>
    %473 = arith.index_cast %c6_i32 : i32 to index
    %c0_255 = arith.constant 0 : index
    %c0_256 = arith.constant 0 : index
    %474 = vector.load %arg14[%473, %c0_255, %c0_256] : memref<8x8x128xf32, #tpu.memory_space<vmem>>, vector<1x8x128xf32>
    %475 = vector.shape_cast %474 : vector<1x8x128xf32> to vector<8x128xf32>
    %476 = arith.truncf %470 : vector<8x32xf32> to vector<8x32xbf16>
    %c0_257 = arith.constant 0 : index
    %c0_258 = arith.constant 0 : index
    %477 = vector.load %arg6[%c0_257, %c0_258] : memref<32x128xbf16, #tpu.memory_space<vmem>>, vector<32x128xbf16>
    %cst_259 = arith.constant dense<0.000000e+00> : vector<8x128xf32>
    %478 = tpu.matmul %476, %477, %cst_259 {dimension_numbers = #tpu.dot_dimension_numbers<[1], [0], [0], [1], [0, 0, 1, 1], [], []>} : vector<8x32xbf16>, vector<32x128xbf16>, vector<8x128xf32> -> vector<8x128xf32>
    %479 = arith.addf %475, %478 : vector<8x128xf32>
    %cst_260 = arith.constant 5.000000e-01 : f32
    %480 = vector.broadcast %cst_260 : f32 to vector<8x128xf32>
    %481 = arith.mulf %480, %479 : vector<8x128xf32>
    %482 = math.tanh %481 : vector<8x128xf32>
    %cst_261 = arith.constant 5.000000e-01 : f32
    %483 = vector.broadcast %cst_261 : f32 to vector<8x128xf32>
    %484 = arith.mulf %483, %482 : vector<8x128xf32>
    %cst_262 = arith.constant 5.000000e-01 : f32
    %485 = vector.broadcast %cst_262 : f32 to vector<8x128xf32>
    %486 = arith.addf %484, %485 : vector<8x128xf32>
    %487 = math.tanh %479 : vector<8x128xf32>
    %488 = vector.extract_strided_slice %486 {offsets = [0, 0], sizes = [8, 32], strides = [1, 1]} : vector<8x128xf32> to vector<8x32xf32>
    %489 = vector.extract_strided_slice %486 {offsets = [0, 32], sizes = [8, 32], strides = [1, 1]} : vector<8x128xf32> to vector<8x32xf32>
    %490 = vector.extract_strided_slice %487 {offsets = [0, 64], sizes = [8, 32], strides = [1, 1]} : vector<8x128xf32> to vector<8x32xf32>
    %491 = vector.extract_strided_slice %486 {offsets = [0, 96], sizes = [8, 32], strides = [1, 1]} : vector<8x128xf32> to vector<8x32xf32>
    %492 = arith.mulf %489, %472 : vector<8x32xf32>
    %493 = arith.mulf %488, %490 : vector<8x32xf32>
    %494 = arith.addf %492, %493 : vector<8x32xf32>
    %495 = math.tanh %494 : vector<8x32xf32>
    %496 = arith.mulf %491, %495 : vector<8x32xf32>
    %497 = arith.select %468, %496, %470 : vector<8x32xi1>, vector<8x32xf32>
    %498 = arith.select %468, %494, %472 : vector<8x32xi1>, vector<8x32xf32>
    %c0_263 = arith.constant 0 : index
    %c0_264 = arith.constant 0 : index
    %c0_265 = arith.constant 0 : index
    %499 = vector.load %arg12[%c0_263, %c0_264, %c0_265] : memref<2x8x32xf32, #tpu.memory_space<vmem>>, vector<1x8x32xf32>
    %500 = vector.shape_cast %499 : vector<1x8x32xf32> to vector<8x32xf32>
    %501 = vector.shape_cast %497 : vector<8x32xf32> to vector<1x8x32xf32>
    tpu.vector_store %arg12[%c0_263, %c0_264, %c0_265], %501 {strides = array<i32>} : memref<2x8x32xf32, #tpu.memory_space<vmem>>, vector<1x8x32xf32>,
    %c0_266 = arith.constant 0 : index
    %c0_267 = arith.constant 0 : index
    %c0_268 = arith.constant 0 : index
    %502 = vector.load %arg13[%c0_266, %c0_267, %c0_268] : memref<2x8x32xf32, #tpu.memory_space<vmem>>, vector<1x8x32xf32>
    %503 = vector.shape_cast %502 : vector<1x8x32xf32> to vector<8x32xf32>
    %504 = vector.shape_cast %498 : vector<8x32xf32> to vector<1x8x32xf32>
    tpu.vector_store %arg13[%c0_266, %c0_267, %c0_268], %504 {strides = array<i32>} : memref<2x8x32xf32, #tpu.memory_space<vmem>>, vector<1x8x32xf32>,
    %c1_269 = arith.constant 1 : index
    %c0_270 = arith.constant 0 : index
    %c0_271 = arith.constant 0 : index
    %505 = vector.load %arg12[%c1_269, %c0_270, %c0_271] : memref<2x8x32xf32, #tpu.memory_space<vmem>>, vector<1x8x32xf32>
    %506 = vector.shape_cast %505 : vector<1x8x32xf32> to vector<8x32xf32>
    %c1_272 = arith.constant 1 : index
    %c0_273 = arith.constant 0 : index
    %c0_274 = arith.constant 0 : index
    %507 = vector.load %arg13[%c1_272, %c0_273, %c0_274] : memref<2x8x32xf32, #tpu.memory_space<vmem>>, vector<1x8x32xf32>
    %508 = vector.shape_cast %507 : vector<1x8x32xf32> to vector<8x32xf32>
    %509 = tpu.concatenate %497, %506 in 1 : vector<8x32xf32>, vector<8x32xf32> -> vector<8x64xf32>
    %510 = arith.truncf %509 : vector<8x64xf32> to vector<8x64xbf16>
    %c0_275 = arith.constant 0 : index
    %c0_276 = arith.constant 0 : index
    %c0_277 = arith.constant 0 : index
    %511 = vector.load %arg7[%c0_275, %c0_276, %c0_277] : memref<1x64x128xbf16, #tpu.memory_space<vmem>>, vector<1x64x128xbf16>
    %512 = vector.shape_cast %511 : vector<1x64x128xbf16> to vector<64x128xbf16>
    %cst_278 = arith.constant dense<0.000000e+00> : vector<8x128xf32>
    %513 = tpu.matmul %510, %512, %cst_278 {dimension_numbers = #tpu.dot_dimension_numbers<[1], [0], [0], [1], [0, 0, 1, 1], [], []>} : vector<8x64xbf16>, vector<64x128xbf16>, vector<8x128xf32> -> vector<8x128xf32>
    %514 = arith.addf %513, %20 : vector<8x128xf32>
    %cst_279 = arith.constant 5.000000e-01 : f32
    %515 = vector.broadcast %cst_279 : f32 to vector<8x128xf32>
    %516 = arith.mulf %515, %514 : vector<8x128xf32>
    %517 = math.tanh %516 : vector<8x128xf32>
    %cst_280 = arith.constant 5.000000e-01 : f32
    %518 = vector.broadcast %cst_280 : f32 to vector<8x128xf32>
    %519 = arith.mulf %518, %517 : vector<8x128xf32>
    %cst_281 = arith.constant 5.000000e-01 : f32
    %520 = vector.broadcast %cst_281 : f32 to vector<8x128xf32>
    %521 = arith.addf %519, %520 : vector<8x128xf32>
    %522 = math.tanh %514 : vector<8x128xf32>
    %523 = vector.extract_strided_slice %521 {offsets = [0, 0], sizes = [8, 32], strides = [1, 1]} : vector<8x128xf32> to vector<8x32xf32>
    %524 = vector.extract_strided_slice %521 {offsets = [0, 32], sizes = [8, 32], strides = [1, 1]} : vector<8x128xf32> to vector<8x32xf32>
    %525 = vector.extract_strided_slice %522 {offsets = [0, 64], sizes = [8, 32], strides = [1, 1]} : vector<8x128xf32> to vector<8x32xf32>
    %526 = vector.extract_strided_slice %521 {offsets = [0, 96], sizes = [8, 32], strides = [1, 1]} : vector<8x128xf32> to vector<8x32xf32>
    %527 = arith.mulf %524, %508 : vector<8x32xf32>
    %528 = arith.mulf %523, %525 : vector<8x32xf32>
    %529 = arith.addf %527, %528 : vector<8x32xf32>
    %530 = math.tanh %529 : vector<8x32xf32>
    %531 = arith.mulf %526, %530 : vector<8x32xf32>
    %532 = arith.select %468, %531, %506 : vector<8x32xi1>, vector<8x32xf32>
    %533 = arith.select %468, %529, %508 : vector<8x32xi1>, vector<8x32xf32>
    %c1_282 = arith.constant 1 : index
    %c0_283 = arith.constant 0 : index
    %c0_284 = arith.constant 0 : index
    %534 = vector.load %arg12[%c1_282, %c0_283, %c0_284] : memref<2x8x32xf32, #tpu.memory_space<vmem>>, vector<1x8x32xf32>
    %535 = vector.shape_cast %534 : vector<1x8x32xf32> to vector<8x32xf32>
    %536 = vector.shape_cast %532 : vector<8x32xf32> to vector<1x8x32xf32>
    tpu.vector_store %arg12[%c1_282, %c0_283, %c0_284], %536 {strides = array<i32>} : memref<2x8x32xf32, #tpu.memory_space<vmem>>, vector<1x8x32xf32>,
    %c1_285 = arith.constant 1 : index
    %c0_286 = arith.constant 0 : index
    %c0_287 = arith.constant 0 : index
    %537 = vector.load %arg13[%c1_285, %c0_286, %c0_287] : memref<2x8x32xf32, #tpu.memory_space<vmem>>, vector<1x8x32xf32>
    %538 = vector.shape_cast %537 : vector<1x8x32xf32> to vector<8x32xf32>
    %539 = vector.shape_cast %533 : vector<8x32xf32> to vector<1x8x32xf32>
    tpu.vector_store %arg13[%c1_285, %c0_286, %c0_287], %539 {strides = array<i32>} : memref<2x8x32xf32, #tpu.memory_space<vmem>>, vector<1x8x32xf32>,
    %c7_i32 = arith.constant 7 : i32
    %540 = arith.addi %21, %c7_i32 : i32
    %541 = vector.broadcast %540 : i32 to vector<8x32xi32>
    %542 = arith.cmpi slt, %541, %16 : vector<8x32xi32>
    %c0_288 = arith.constant 0 : index
    %c0_289 = arith.constant 0 : index
    %c0_290 = arith.constant 0 : index
    %543 = vector.load %arg12[%c0_288, %c0_289, %c0_290] : memref<2x8x32xf32, #tpu.memory_space<vmem>>, vector<1x8x32xf32>
    %544 = vector.shape_cast %543 : vector<1x8x32xf32> to vector<8x32xf32>
    %c0_291 = arith.constant 0 : index
    %c0_292 = arith.constant 0 : index
    %c0_293 = arith.constant 0 : index
    %545 = vector.load %arg13[%c0_291, %c0_292, %c0_293] : memref<2x8x32xf32, #tpu.memory_space<vmem>>, vector<1x8x32xf32>
    %546 = vector.shape_cast %545 : vector<1x8x32xf32> to vector<8x32xf32>
    %547 = arith.index_cast %c7_i32 : i32 to index
    %c0_294 = arith.constant 0 : index
    %c0_295 = arith.constant 0 : index
    %548 = vector.load %arg14[%547, %c0_294, %c0_295] : memref<8x8x128xf32, #tpu.memory_space<vmem>>, vector<1x8x128xf32>
    %549 = vector.shape_cast %548 : vector<1x8x128xf32> to vector<8x128xf32>
    %550 = arith.truncf %544 : vector<8x32xf32> to vector<8x32xbf16>
    %c0_296 = arith.constant 0 : index
    %c0_297 = arith.constant 0 : index
    %551 = vector.load %arg6[%c0_296, %c0_297] : memref<32x128xbf16, #tpu.memory_space<vmem>>, vector<32x128xbf16>
    %cst_298 = arith.constant dense<0.000000e+00> : vector<8x128xf32>
    %552 = tpu.matmul %550, %551, %cst_298 {dimension_numbers = #tpu.dot_dimension_numbers<[1], [0], [0], [1], [0, 0, 1, 1], [], []>} : vector<8x32xbf16>, vector<32x128xbf16>, vector<8x128xf32> -> vector<8x128xf32>
    %553 = arith.addf %549, %552 : vector<8x128xf32>
    %cst_299 = arith.constant 5.000000e-01 : f32
    %554 = vector.broadcast %cst_299 : f32 to vector<8x128xf32>
    %555 = arith.mulf %554, %553 : vector<8x128xf32>
    %556 = math.tanh %555 : vector<8x128xf32>
    %cst_300 = arith.constant 5.000000e-01 : f32
    %557 = vector.broadcast %cst_300 : f32 to vector<8x128xf32>
    %558 = arith.mulf %557, %556 : vector<8x128xf32>
    %cst_301 = arith.constant 5.000000e-01 : f32
    %559 = vector.broadcast %cst_301 : f32 to vector<8x128xf32>
    %560 = arith.addf %558, %559 : vector<8x128xf32>
    %561 = math.tanh %553 : vector<8x128xf32>
    %562 = vector.extract_strided_slice %560 {offsets = [0, 0], sizes = [8, 32], strides = [1, 1]} : vector<8x128xf32> to vector<8x32xf32>
    %563 = vector.extract_strided_slice %560 {offsets = [0, 32], sizes = [8, 32], strides = [1, 1]} : vector<8x128xf32> to vector<8x32xf32>
    %564 = vector.extract_strided_slice %561 {offsets = [0, 64], sizes = [8, 32], strides = [1, 1]} : vector<8x128xf32> to vector<8x32xf32>
    %565 = vector.extract_strided_slice %560 {offsets = [0, 96], sizes = [8, 32], strides = [1, 1]} : vector<8x128xf32> to vector<8x32xf32>
    %566 = arith.mulf %563, %546 : vector<8x32xf32>
    %567 = arith.mulf %562, %564 : vector<8x32xf32>
    %568 = arith.addf %566, %567 : vector<8x32xf32>
    %569 = math.tanh %568 : vector<8x32xf32>
    %570 = arith.mulf %565, %569 : vector<8x32xf32>
    %571 = arith.select %542, %570, %544 : vector<8x32xi1>, vector<8x32xf32>
    %572 = arith.select %542, %568, %546 : vector<8x32xi1>, vector<8x32xf32>
    %c0_302 = arith.constant 0 : index
    %c0_303 = arith.constant 0 : index
    %c0_304 = arith.constant 0 : index
    %573 = vector.load %arg12[%c0_302, %c0_303, %c0_304] : memref<2x8x32xf32, #tpu.memory_space<vmem>>, vector<1x8x32xf32>
    %574 = vector.shape_cast %573 : vector<1x8x32xf32> to vector<8x32xf32>
    %575 = vector.shape_cast %571 : vector<8x32xf32> to vector<1x8x32xf32>
    tpu.vector_store %arg12[%c0_302, %c0_303, %c0_304], %575 {strides = array<i32>} : memref<2x8x32xf32, #tpu.memory_space<vmem>>, vector<1x8x32xf32>,
    %c0_305 = arith.constant 0 : index
    %c0_306 = arith.constant 0 : index
    %c0_307 = arith.constant 0 : index
    %576 = vector.load %arg13[%c0_305, %c0_306, %c0_307] : memref<2x8x32xf32, #tpu.memory_space<vmem>>, vector<1x8x32xf32>
    %577 = vector.shape_cast %576 : vector<1x8x32xf32> to vector<8x32xf32>
    %578 = vector.shape_cast %572 : vector<8x32xf32> to vector<1x8x32xf32>
    tpu.vector_store %arg13[%c0_305, %c0_306, %c0_307], %578 {strides = array<i32>} : memref<2x8x32xf32, #tpu.memory_space<vmem>>, vector<1x8x32xf32>,
    %c1_308 = arith.constant 1 : index
    %c0_309 = arith.constant 0 : index
    %c0_310 = arith.constant 0 : index
    %579 = vector.load %arg12[%c1_308, %c0_309, %c0_310] : memref<2x8x32xf32, #tpu.memory_space<vmem>>, vector<1x8x32xf32>
    %580 = vector.shape_cast %579 : vector<1x8x32xf32> to vector<8x32xf32>
    %c1_311 = arith.constant 1 : index
    %c0_312 = arith.constant 0 : index
    %c0_313 = arith.constant 0 : index
    %581 = vector.load %arg13[%c1_311, %c0_312, %c0_313] : memref<2x8x32xf32, #tpu.memory_space<vmem>>, vector<1x8x32xf32>
    %582 = vector.shape_cast %581 : vector<1x8x32xf32> to vector<8x32xf32>
    %583 = tpu.concatenate %571, %580 in 1 : vector<8x32xf32>, vector<8x32xf32> -> vector<8x64xf32>
    %584 = arith.truncf %583 : vector<8x64xf32> to vector<8x64xbf16>
    %c0_314 = arith.constant 0 : index
    %c0_315 = arith.constant 0 : index
    %c0_316 = arith.constant 0 : index
    %585 = vector.load %arg7[%c0_314, %c0_315, %c0_316] : memref<1x64x128xbf16, #tpu.memory_space<vmem>>, vector<1x64x128xbf16>
    %586 = vector.shape_cast %585 : vector<1x64x128xbf16> to vector<64x128xbf16>
    %cst_317 = arith.constant dense<0.000000e+00> : vector<8x128xf32>
    %587 = tpu.matmul %584, %586, %cst_317 {dimension_numbers = #tpu.dot_dimension_numbers<[1], [0], [0], [1], [0, 0, 1, 1], [], []>} : vector<8x64xbf16>, vector<64x128xbf16>, vector<8x128xf32> -> vector<8x128xf32>
    %588 = arith.addf %587, %20 : vector<8x128xf32>
    %cst_318 = arith.constant 5.000000e-01 : f32
    %589 = vector.broadcast %cst_318 : f32 to vector<8x128xf32>
    %590 = arith.mulf %589, %588 : vector<8x128xf32>
    %591 = math.tanh %590 : vector<8x128xf32>
    %cst_319 = arith.constant 5.000000e-01 : f32
    %592 = vector.broadcast %cst_319 : f32 to vector<8x128xf32>
    %593 = arith.mulf %592, %591 : vector<8x128xf32>
    %cst_320 = arith.constant 5.000000e-01 : f32
    %594 = vector.broadcast %cst_320 : f32 to vector<8x128xf32>
    %595 = arith.addf %593, %594 : vector<8x128xf32>
    %596 = math.tanh %588 : vector<8x128xf32>
    %597 = vector.extract_strided_slice %595 {offsets = [0, 0], sizes = [8, 32], strides = [1, 1]} : vector<8x128xf32> to vector<8x32xf32>
    %598 = vector.extract_strided_slice %595 {offsets = [0, 32], sizes = [8, 32], strides = [1, 1]} : vector<8x128xf32> to vector<8x32xf32>
    %599 = vector.extract_strided_slice %596 {offsets = [0, 64], sizes = [8, 32], strides = [1, 1]} : vector<8x128xf32> to vector<8x32xf32>
    %600 = vector.extract_strided_slice %595 {offsets = [0, 96], sizes = [8, 32], strides = [1, 1]} : vector<8x128xf32> to vector<8x32xf32>
    %601 = arith.mulf %598, %582 : vector<8x32xf32>
    %602 = arith.mulf %597, %599 : vector<8x32xf32>
    %603 = arith.addf %601, %602 : vector<8x32xf32>
    %604 = math.tanh %603 : vector<8x32xf32>
    %605 = arith.mulf %600, %604 : vector<8x32xf32>
    %606 = arith.select %542, %605, %580 : vector<8x32xi1>, vector<8x32xf32>
    %607 = arith.select %542, %603, %582 : vector<8x32xi1>, vector<8x32xf32>
    %c1_321 = arith.constant 1 : index
    %c0_322 = arith.constant 0 : index
    %c0_323 = arith.constant 0 : index
    %608 = vector.load %arg12[%c1_321, %c0_322, %c0_323] : memref<2x8x32xf32, #tpu.memory_space<vmem>>, vector<1x8x32xf32>
    %609 = vector.shape_cast %608 : vector<1x8x32xf32> to vector<8x32xf32>
    %610 = vector.shape_cast %606 : vector<8x32xf32> to vector<1x8x32xf32>
    tpu.vector_store %arg12[%c1_321, %c0_322, %c0_323], %610 {strides = array<i32>} : memref<2x8x32xf32, #tpu.memory_space<vmem>>, vector<1x8x32xf32>,
    %c1_324 = arith.constant 1 : index
    %c0_325 = arith.constant 0 : index
    %c0_326 = arith.constant 0 : index
    %611 = vector.load %arg13[%c1_324, %c0_325, %c0_326] : memref<2x8x32xf32, #tpu.memory_space<vmem>>, vector<1x8x32xf32>
    %612 = vector.shape_cast %611 : vector<1x8x32xf32> to vector<8x32xf32>
    %613 = vector.shape_cast %607 : vector<8x32xf32> to vector<1x8x32xf32>
    tpu.vector_store %arg13[%c1_324, %c0_325, %c0_326], %613 {strides = array<i32>} : memref<2x8x32xf32, #tpu.memory_space<vmem>>, vector<1x8x32xf32>,
    %c8_i32_327 = arith.constant 8 : i32
    %c1_i32_328 = arith.constant 1 : i32
    %614 = arith.cmpi eq, %arg1, %c1_i32_328 : i32
    %615 = arith.extui %614 : i1 to i32
    %c0_i32_329 = arith.constant 0 : i32
    %616 = arith.cmpi ne, %615, %c0_i32_329 : i32
    scf.if %616 {
      %c1_330 = arith.constant 1 : index
      %c0_331 = arith.constant 0 : index
      %c0_332 = arith.constant 0 : index
      %617 = vector.load %arg12[%c1_330, %c0_331, %c0_332] : memref<2x8x32xf32, #tpu.memory_space<vmem>>, vector<1x8x32xf32>
      %618 = vector.shape_cast %617 : vector<1x8x32xf32> to vector<8x32xf32>
      %619 = arith.truncf %618 : vector<8x32xf32> to vector<8x32xbf16>
      %c0_333 = arith.constant 0 : index
      %c0_334 = arith.constant 0 : index
      %620 = vector.load %arg9[%c0_333, %c0_334] : memref<32x128xbf16, #tpu.memory_space<vmem>>, vector<32x128xbf16>
      %cst_335 = arith.constant dense<0.000000e+00> : vector<8x128xf32>
      %621 = tpu.matmul %619, %620, %cst_335 {dimension_numbers = #tpu.dot_dimension_numbers<[1], [0], [0], [1], [0, 0, 1, 1], [], []>} : vector<8x32xbf16>, vector<32x128xbf16>, vector<8x128xf32> -> vector<8x128xf32>
      %c0_336 = arith.constant 0 : index
      %c0_337 = arith.constant 0 : index
      %622 = vector.load %arg10[%c0_336, %c0_337] : memref<1x128xf32, #tpu.memory_space<vmem>>, vector<1x128xf32>
      %623 = vector.broadcast %622 : vector<1x128xf32> to vector<8x128xf32>
      %624 = arith.addf %621, %623 : vector<8x128xf32>
      %c0_338 = arith.constant 0 : index
      %c0_339 = arith.constant 0 : index
      %625 = vector.load %arg11[%c0_338, %c0_339] : memref<8x128xf32, #tpu.memory_space<vmem>>, vector<8x128xf32>
      tpu.vector_store %arg11[%c0_338, %c0_339], %624 {strides = array<i32>} : memref<8x128xf32, #tpu.memory_space<vmem>>, vector<8x128xf32>,
    } else {
    }
    return
  }
  func.func @transform_0(%arg0: i32, %arg1: i32) -> (i32, i32, i32) {
    %c0_i32 = arith.constant 0 : i32
    %c0_i32_0 = arith.constant 0 : i32
    return %arg1, %arg0, %c0_i32 : i32, i32, i32
  }
  func.func @transform_1(%arg0: i32, %arg1: i32) -> (i32, i32) {
    %c0_i32 = arith.constant 0 : i32
    %c0_i32_0 = arith.constant 0 : i32
    return %arg0, %c0_i32 : i32, i32
  }
  func.func @transform_2(%arg0: i32, %arg1: i32) -> (i32, i32) {
    %c0_i32 = arith.constant 0 : i32
    %c0_i32_0 = arith.constant 0 : i32
    %c0_i32_1 = arith.constant 0 : i32
    return %c0_i32, %c0_i32_0 : i32, i32
  }
  func.func @transform_3(%arg0: i32, %arg1: i32) -> (i32, i32) {
    %c0_i32 = arith.constant 0 : i32
    %c0_i32_0 = arith.constant 0 : i32
    %c0_i32_1 = arith.constant 0 : i32
    return %c0_i32, %c0_i32_0 : i32, i32
  }
  func.func @transform_4(%arg0: i32, %arg1: i32) -> (i32, i32) {
    %c0_i32 = arith.constant 0 : i32
    %c0_i32_0 = arith.constant 0 : i32
    %c0_i32_1 = arith.constant 0 : i32
    return %c0_i32, %c0_i32_0 : i32, i32
  }
  func.func @transform_5(%arg0: i32, %arg1: i32) -> (i32, i32, i32) {
    %c0_i32 = arith.constant 0 : i32
    %c0_i32_0 = arith.constant 0 : i32
    %c0_i32_1 = arith.constant 0 : i32
    %c0_i32_2 = arith.constant 0 : i32
    return %c0_i32, %c0_i32_0, %c0_i32_1 : i32, i32, i32
  }
  func.func @transform_6(%arg0: i32, %arg1: i32) -> (i32, i32, i32) {
    %c0_i32 = arith.constant 0 : i32
    %c0_i32_0 = arith.constant 0 : i32
    %c0_i32_1 = arith.constant 0 : i32
    %c0_i32_2 = arith.constant 0 : i32
    return %c0_i32, %c0_i32_0, %c0_i32_1 : i32, i32, i32
  }
  func.func @transform_7(%arg0: i32, %arg1: i32) -> (i32, i32) {
    %c0_i32 = arith.constant 0 : i32
    %c0_i32_0 = arith.constant 0 : i32
    %c0_i32_1 = arith.constant 0 : i32
    return %c0_i32, %c0_i32_0 : i32, i32
  }
  func.func @transform_8(%arg0: i32, %arg1: i32) -> (i32, i32) {
    %c0_i32 = arith.constant 0 : i32
    %c0_i32_0 = arith.constant 0 : i32
    %c0_i32_1 = arith.constant 0 : i32
    return %c0_i32, %c0_i32_0 : i32, i32
  }
  func.func @transform_9(%arg0: i32, %arg1: i32) -> (i32, i32) {
    %c0_i32 = arith.constant 0 : i32
    %c0_i32_0 = arith.constant 0 : i32
    return %arg0, %c0_i32 : i32, i32
  }
}

</mosaic_0001>

<bundles_post_ra>
// kernel: rnn_model_forward.1
= control target key start
LH: loop header
LB: loop body
LE: loop exit
PB: predicated region body
PF: predicated region fallthrough
CT: control target
= control target key end

     0   :  { %s2582_s30 = smov 0   ;;  %s2584_s10 = smov 0   ;;  %s3140_s0 = inlined_call_operand.vmem [shape: bf16[16,8,48], index: 0, kind: input, shape index: {}]   ;;  %s3141_s1 = inlined_call_operand.vmem [shape: s32[8,1], index: 1, kind: input, shape index: {}]   ;;  %s3142_s2 = inlined_call_operand.vmem [shape: bf16[48,128], index: 2, kind: input, shape index: {}]   ;;  %s3143_s3 = inlined_call_operand.vmem [shape: f32[1,128], index: 3, kind: input, shape index: {}]   ;;  %s3144_s4 = inlined_call_operand.vmem [shape: bf16[32,128], index: 4, kind: input, shape index: {}]   ;;  %s3145_s5 = inlined_call_operand.vmem [shape: bf16[1,64,128], index: 5, kind: input, shape index: {}]   ;;  %s3146_s6 = inlined_call_operand.vmem [shape: f32[1,1,128], index: 6, kind: input, shape index: {}]   ;;  %s3147_s7 = inlined_call_operand.vmem [shape: bf16[32,128], index: 7, kind: input, shape index: {}]   ;;  %s3148_s8 = inlined_call_operand.vmem [shape: f32[1,128], index: 8, kind: input, shape index: {}]   ;;  %s3149_s9 = inlined_call_operand.vmem [shape: f32[8,128], index: 9, kind: output, shape index: {}]  }
   0x1   :  { %s2586_s11 = smov 0  }
   0x2 LB: > { %s28_s12 = sadd.s32 1, %s2521_s10  ;;  %p2056_p0 = scmp.ge.s32.totalorder %s2525_s11, 1  ;;  %s2525_s11 = sphi %s2586_s11, %s19_s11   ;;  %s2521_s10 = sphi %s2584_s10, %s3153_s10   ;;  %s2517_s30 = sphi %s2582_s30, %s3152_s30  }
   0x3   : > { %p29_p1 = scmp.ge.s32.totalorder %s28_s12, 2  ;;  %p314_p2 = scmp.lt.s32.totalorder %s2525_s11, 3 }
   0x5   : > { %s3155_s12 = smov (%p29_p1, %s28_s12), 0  ;;  %p315_p3 = pnand %p2056_p0, %p314_p2 }
   0x6   : > { %s2603_s13 = sshll.u32 (!%p315_p3), %s2517_s30, 3  ;;  %p2059_p5 = scmp.ne.s32.totalorder (!%p315_p3), %s2517_s30, 0 }
   0x7   : > { %318 = sbr.rel (%p315_p3) target bundleno = 6007 (0x1777), region = 56  ;;  %p357_p4 = scmp.lt.s32.totalorder (!%p315_p3), %s2603_s13, 15 }
   0xc   : > { %s358_s14 = scalar_select %p357_p4, %s2603_s13, 15 }
   0xd   : > { %377 = sbr.rel (%p2059_p5) target bundleno = 23 (0x17), region = 60 }
   0xe   : > { %s2058_s15 = sshll.u32 %s358_s14, 2 }
   0xf   : > { %s2610_s18 = scalar_lea.vmem %s3140_s0, %s2058_s15 }
  0x12   : > { %vm378_vm0 = vcmask 261120   ;;  %v2527_v0 = vmov 0.0  }
  0x13   : > { %379 = vst.msk [vmem:[#allocation2] sm:$0xff] %vm378_vm0, %v2527_v0 }
  0x14   : > { %380 = vst.msk [vmem:[#allocation2 + $0x8] sm:$0xff] %vm378_vm0, %v2527_v0 }
  0x15   : > { %381 = vst.msk [vmem:[#allocation3] sm:$0xff] %vm378_vm0, %v2527_v0 }
  0x16   : > { %382 = vst.msk [vmem:[#allocation3 + $0x8] sm:$0xff] %vm378_vm0, %v2527_v0 }
  0x17 PF: > { %v2320_v1 = vld [vmem:[%s3142_s2 + $0x10] sm:$0xff]  ;;  %v2322_v2 = vld [vmem:[%s3144_s4 + $0x8] sm:$0xff]  ;;  %v2321_v4 = vld [vmem:[%s3144_s4] sm:$0xff]  ;;  %vm512_vm1 = vcmask 261120   ;;  %vm431_vm2 = vcmask 392192   ;;  %s2528_s15 = smov 64   ;;  %v490_v35 = vstv %s2603_s13 }
  0x18   : > { %v2319_v3 = vld [vmem:[%s3142_s2 + $0x8] sm:$0xff]  ;;  %449 = vmatpush.bf16.msra.mxu0 %v2320_v1  ;;  %522 = vmatpush.bf16.msra.mxu1 %v2322_v2  ;;  %v2318_v7 = vld [vmem:[%s3142_s2] sm:$0xff]  ;;  %s2529_s16 = smov 32   ;;  %v2530_v18 = vmov 0   ;;  %s2531_s20 = smov 96   ;;  %v2326_v31 = vld [vmem:[%s3145_s5 + $0x18] sm:$0xff] }
  0x19   : > { %v2314_v8 = vld [vmem:[%s2610_s18] sm:$0xff]  ;;  %2400 = vset.pattern.permute.xlu2 %v2530_v18  ;;  %2401 = vset.pattern.permute.xlu0 %v2530_v18  ;;  %v2325_v32 = vld [vmem:[%s3145_s5 + $0x10] sm:$0xff]  ;;  %v2324_v33 = vld [vmem:[%s3145_s5 + $0x8] sm:$0xff]  ;;  %vm614_vm4 = vcmask 523264   ;;  %s672_s23 = sadd.s32 1, %s2603_s13  ;;  %s852_s24 = sadd.s32 2, %s2603_s13 }
  0x1a   : > { %v492_v5 = vld [vmem:[#allocation2] sm:$0xff]  ;;  %622 = vmatpush.bf16.msra.mxu2 %v2326_v31  ;;  %v2328_v43 = vld [vmem:[%s3144_s4 + $0x8] sm:$0xff]  ;;  %s1032_s25 = sadd.s32 3, %s2603_s13  ;;  %s1212_s26 = sadd.s32 4, %s2603_s13 }
  0x1b   : > { %v495_v6 = vpack.c.bf16 %v492_v5, %v492_v5  ;;  %v2634_v10 = vld [vmem:[%s3143_s3] ss:$0 sm:$0xff]  ;;  %v573_v30 = vld [vmem:[#allocation2 + $0x8] sm:$0xff]  ;;  %705 = vmatpush.bf16.msra.mxu3 %v2328_v43  ;;  %v2331_v43 = vld [vmem:[%s3145_s5 + $0x10] sm:$0xff]  ;;  %s1392_s27 = sadd.s32 5, %s2603_s13  ;;  %s1572_s29 = sadd.s32 6, %s2603_s13 }
  0x1c   : > { %450 = vmatpush.bf16.msra.mxu0 %v2319_v3  ;;  %523 = vmatpush.bf16.msra.mxu1 %v2321_v4  ;;  %v493_v16 = vld [vmem:[#allocation3] sm:$0xff]  ;;  %v481_v17 = vld [vmem:[%s3141_s1] sm:$0xff]  ;;  %s1752_s17 = sadd.s32 7, %s2603_s13  ;;  %p2301_p6 = scmp.ne.s32.totalorder %s2517_s30, 1 }
  0x1d   : > { %483 = vperm.xlu2 %2400, %v481_v17   ;;  %v2323_v42 = vld [vmem:[%s3145_s5] sm:$0xff]  ;;  %v575_v45 = vld [vmem:[#allocation3 + $0x8] sm:$0xff] }
  0x1e   : > { %623 = vmatpush.bf16.msra.mxu2 %v2325_v32  ;;  %v2327_v44 = vld [vmem:[%s3144_s4] sm:$0xff]  ;;  %v2709_v32 = vstv %s672_s23 }
  0x1f   : > { %2101 = vmatmul.msk.bf16.vlgmr.msra.gmra.mxu1 %vm512_vm1, %v495_v6  ;;  %706 = vmatpush.bf16.msra.mxu3 %v2327_v44  ;;  %v2690_v54 = vld [vmem:[%s3146_s6] ss:$0 sm:$0xff] }
  0x20   : > { %451 = vmatpush.bf16.msra.mxu0 %v2318_v7  ;;  %v2333_v39 = vld [vmem:[%s3144_s4] sm:$0xff] }
  0x22   : > { %624 = vmatpush.bf16.msra.mxu2 %v2324_v33 }
  0x23   : > { %2088 = vmatmul.msk.bf16.vlgmr.msra.gmra.mxu0 %vm431_vm2, %v2314_v8 }
  0x25   : > { %557 = vrot.lane.b32.xlu2 %v492_v5, %s2531_s20 }
  0x26   : > { %625 = vmatpush.bf16.msra.mxu2 %v2323_v42  ;;  %v2332_v42 = vld [vmem:[%s3145_s5 + $0x18] sm:$0xff] }
  0x27   : > { %802 = vmatpush.bf16.msrb.mxu1 %v2332_v42  ;;  %v2336_v42 = vld [vmem:[%s3145_s5 + $0x8] sm:$0xff] }
  0x2b   : > { %803 = vmatpush.bf16.msrb.mxu1 %v2331_v43 }
  0x77   : > { %v2655_v34 = vpop.permute.xlu2 %483 }
  0x78   : > { %vm2659_vm3 = vcmp.lt.s32.totalorder %v490_v35, %v2655_v34  ;;  %vm674_vm5 = vcmp.lt.s32.totalorder %v2709_v32, %v2655_v34  ;;  %v2340_v32 = vld [vmem:[%s3144_s4 + $0x8] sm:$0xff] }
  0x7f   : > { %v558_v37 = vpop.permute.xlu2 %557 }
  0x9c   : > { %v525_v9 = vpop.f32.mrf.mxu1 }
  0xa0   : > { %v453_v11 = vpop.f32.mrf.mxu0 }
  0xa1   : > { %v454_v12 = vadd.f32 %v2634_v10, %v453_v11 }
  0xa3   : > { %v529_v13 = vadd.f32 %v525_v9, %v454_v12 }
  0xa4   : > { %v527_v14 = vpop.f32.mrf.mxu1 }
  0xa5   : > { %2404 = vtanh.f32 %v529_v13  ;;  %v530_v19 = vmul.f32 0.5, %v529_v13 }
  0xa7   : > { %2406 = vtanh.f32 %v530_v19 }
  0xa8   : > { %v455_v57 = vpop.f32.mrf.mxu0 }
  0xa9   : > { %v456_v58 = vadd.f32 %v2634_v10, %v455_v57 }
  0xab   : > { %v2405_v15 = vpop.eup %2404 }
  0xac   : > { %541 = vrot.lane.b32.xlu0 %v2405_v15, %s2528_s15 }
  0xad   : > { %v2407_v20 = vpop.eup %2406 }
  0xae   : > { %v532_v21 = vmul.f32 0.5, %v2407_v20 }
  0xb0   : > { %v533_v22 = vadd.f32 0.5, %v532_v21 }
  0xb4   : > { %536 = vrot.lane.b32.xlu0 %v493_v16, %s2529_s16 }
 0x11e   : > { %v542_v23 = vpop.permute.xlu0 %541 }
 0x11f   : > { %v544_v24 = vmul.f32 %v542_v23, %v533_v22 }
 0x121   : > { %546 = vrot.lane.b32.xlu1 %v544_v24, %s2529_s16 }
 0x126   : > { %v537_v25 = vpop.permute.xlu0 %536 }
 0x127   : > { %v539_v26 = vmul.f32 %v537_v25, %v533_v22 }
 0x193   : > { %v547_v27 = vpop.permute.xlu1 %546 }
 0x194   : > { %v549_v28 = vadd.f32 %v547_v27, %v539_v26 }
 0x196   : > { %2408 = vtanh.f32 %v549_v28  ;;  %v561_v41 = vsel %vm2659_vm3, %v549_v28, %v537_v25 }
 0x19c   : > { %v2409_v29 = vpop.eup %2408 }
 0x19d   : > { %552 = vrot.lane.b32.xlu1 %v2409_v29, %s2528_s15 }
 0x1a5   : > { %577 = vrot.lane.b32.xlu1 %v573_v30, %s2529_s16 }
 0x1ad   : > { %637 = vrot.lane.b32.xlu1 %v575_v45, %s2529_s16  ;;  %v2330_v45 = vld [vmem:[%s3145_s5 + $0x8] sm:$0xff] }
 0x1ae   : > { %804 = vmatpush.bf16.msrb.mxu1 %v2330_v45 }
 0x20f   : > { %v553_v36 = vpop.permute.xlu1 %552 }
 0x210   : > { %v555_v38 = vmul.f32 %v553_v36, %v533_v22 }
 0x212   : > { %v560_v40 = vsel %vm2659_vm3, %v555_v38, %v558_v37  ;;  %v2334_v38 = vld [vmem:[%s3144_s4 + $0x8] sm:$0xff] }
 0x213   : > { %563 = vrot.lane.b32.xlu0 %v560_v40, %s2529_s16  ;;  %885 = vmatpush.bf16.msrb.mxu3 %v2334_v38 }
 0x217   : > { %v578_v46 = vpop.permute.xlu1 %577  ;;  %886 = vmatpush.bf16.msrb.mxu3 %v2333_v39  ;;  %v2339_v39 = vld [vmem:[%s3144_s4] sm:$0xff] }
 0x21b   : > { %568 = vrot.lane.b32.xlu0 %v561_v41, %s2531_s20  ;;  %v2315_v41 = vld [vmem:[%s2610_s18 + $0x8] sm:$0xff] }
 0x21c   : > { %2089 = vmatmul.msk.bf16.gmra.mxu0 %vm431_vm2, %v2315_v41  ;;  %v2337_v41 = vld [vmem:[%s3145_s5 + $0x10] sm:$0xff] }
 0x21f   : > { %v638_v14 = vpop.permute.xlu1 %637 }
 0x285   : > { %v564_v47 = vpop.permute.xlu0 %563 }
 0x286   : > { %566 = vst.msk [vmem:[#allocation2] sm:$0xff] %vm512_vm1, %v564_v47  ;;  %v580_v48 = vsel %vm512_vm1, %v564_v47, %v578_v46  ;;  %v2329_v46 = vld [vmem:[%s3145_s5] sm:$0xff] }
 0x287   : > { %v581_v49 = vpack.c.bf16 %v580_v48, %v580_v48  ;;  %805 = vmatpush.bf16.msrb.mxu1 %v2329_v46 }
 0x289   : > { %2118 = vmatmul.msk.bf16.vlgmr.msra.gmra.mxu2 %vm614_vm4, %v581_v49 }
 0x28b   : > { %1065 = vmatpush.bf16.msra.mxu1 %v2340_v32 }
 0x28d   : > { %v569_v50 = vpop.permute.xlu0 %568  ;;  %v675_v51 = vld [vmem:[#allocation2] sm:$0xff] }
 0x28e   : > { %571 = vst.msk [vmem:[#allocation3] sm:$0xff] %vm512_vm1, %v569_v50  ;;  %v679_v52 = vpack.c.bf16 %v675_v51, %v675_v51 }
 0x28f   : > { %1066 = vmatpush.bf16.msra.mxu1 %v2339_v39  ;;  %v2345_v39 = vld [vmem:[%s3144_s4] sm:$0xff] }
 0x290   : > { %2127 = vmatmul.msk.bf16.vlgmr.msra.gmra.mxu3 %vm512_vm1, %v679_v52 }
 0x295   : > { %v676_v53 = vld [vmem:[#allocation3] sm:$0xff] }
 0x296   : > { %719 = vrot.lane.b32.xlu1 %v676_v53, %s2529_s16 }
 0x29e   : > { %657 = vrot.lane.b32.xlu1 %v573_v30, %s2531_s20 }
 0x2a6   : > { %740 = vrot.lane.b32.xlu1 %v675_v51, %s2531_s20 }
 0x308   : > { %v720_v20 = vpop.permute.xlu1 %719 }
 0x30c   : > { %v627_v55 = vpop.f32.mrf.mxu2 }
 0x30d   : > { %v628_v56 = vadd.f32 %v2690_v54, %v627_v55 }
 0x30f   : > { %2410 = vtanh.f32 %v628_v56  ;;  %v631_v1 = vmul.f32 0.5, %v628_v56  ;;  %v458_v56 = vpop.f32.mrf.mxu0 }
 0x310   : > { %v658_v25 = vpop.permute.xlu1 %657  ;;  %v459_v57 = vadd.f32 %v2634_v10, %v458_v56 }
 0x313   : > { %v708_v59 = vpop.f32.mrf.mxu3 }
 0x314   : > { %v712_v60 = vadd.f32 %v708_v59, %v456_v58  ;;  %v629_v61 = vpop.f32.mrf.mxu2 }
 0x315   : > { %v2411_v62 = vpop.eup %2410 }
 0x316   : > { %2412 = vtanh.f32 %v712_v60  ;;  %642 = vrot.lane.b32.xlu2 %v2411_v62, %s2528_s15  ;;  %v713_v7 = vmul.f32 0.5, %v712_v60 }
 0x317   : > { %2414 = vtanh.f32 %v631_v1  ;;  %v460_v56 = vpop.f32.mrf.mxu0 }
 0x318   : > { %2416 = vtanh.f32 %v713_v7  ;;  %v741_v26 = vpop.permute.xlu1 %740 }
 0x31b   : > { %v710_v63 = vpop.f32.mrf.mxu3 }
 0x31c   : > { %v2413_v0 = vpop.eup %2412 }
 0x31d   : > { %724 = vrot.lane.b32.xlu0 %v2413_v0, %s2528_s15  ;;  %v2415_v2 = vpop.eup %2414 }
 0x31e   : > { %v633_v3 = vmul.f32 0.5, %v2415_v2  ;;  %v2417_v8 = vpop.eup %2416 }
 0x31f   : > { %v715_v9 = vmul.f32 0.5, %v2417_v8 }
 0x320   : > { %v634_v4 = vadd.f32 0.5, %v633_v3 }
 0x321   : > { %v716_v11 = vadd.f32 0.5, %v715_v9 }
 0x322   : > { %v640_v15 = vmul.f32 %v638_v14, %v634_v4 }
 0x323   : > { %v722_v21 = vmul.f32 %v720_v20, %v716_v11 }
 0x370   : > { %v643_v5 = vpop.permute.xlu2 %642 }
 0x371   : > { %v645_v6 = vmul.f32 %v643_v5, %v634_v4 }
 0x373   : > { %647 = vrot.lane.b32.xlu2 %v645_v6, %s2529_s16 }
 0x38f   : > { %v725_v12 = vpop.permute.xlu0 %724 }
 0x390   : > { %v727_v13 = vmul.f32 %v725_v12, %v716_v11 }
 0x392   : > { %729 = vrot.lane.b32.xlu2 %v727_v13, %s2529_s16 }
 0x3cd   : > { %v648_v16 = vpop.permute.xlu2 %647 }
 0x3ce   : > { %v650_v17 = vadd.f32 %v648_v16, %v640_v15 }
 0x3d0   : > { %2418 = vtanh.f32 %v650_v17  ;;  %v661_v18 = vsel %vm2659_vm3, %v650_v17, %v638_v14 }
 0x3d1   : > { %668 = vrot.lane.b32.xlu1 %v661_v18, %s2531_s20 }
 0x3d6   : > { %v2419_v19 = vpop.eup %2418 }
 0x3d7   : > { %653 = vrot.lane.b32.xlu0 %v2419_v19, %s2528_s15 }
 0x3ec   : > { %v730_v22 = vpop.permute.xlu2 %729 }
 0x3ed   : > { %v732_v23 = vadd.f32 %v730_v22, %v722_v21 }
 0x3ef   : > { %2420 = vtanh.f32 %v732_v23  ;;  %v744_v44 = vsel %vm674_vm5, %v732_v23, %v720_v20 }
 0x3f5   : > { %v2421_v24 = vpop.eup %2420 }
 0x3f6   : > { %735 = vrot.lane.b32.xlu0 %v2421_v24, %s2528_s15 }
 0x443   : > { %v669_v27 = vpop.permute.xlu1 %668 }
 0x444   : > { %671 = vst.msk [vmem:[#allocation3 + $0x8] sm:$0xff] %vm512_vm1, %v669_v27 }
 0x449   : > { %v654_v28 = vpop.permute.xlu0 %653 }
 0x44a   : > { %v656_v29 = vmul.f32 %v654_v28, %v634_v4 }
 0x44b   : > { %v756_v30 = vld [vmem:[#allocation3 + $0x8] sm:$0xff] }
 0x44c   : > { %817 = vrot.lane.b32.xlu1 %v756_v30, %s2529_s16  ;;  %v660_v31 = vsel %vm2659_vm3, %v656_v29, %v658_v25 }
 0x44d   : > { %663 = vrot.lane.b32.xlu2 %v660_v31, %s2529_s16 }
 0x468   : > { %v736_v33 = vpop.permute.xlu0 %735 }
 0x469   : > { %v738_v35 = vmul.f32 %v736_v33, %v716_v11 }
 0x46b   : > { %v743_v36 = vsel %vm674_vm5, %v738_v35, %v741_v26  ;;  %v2770_v35 = vstv %s852_s24 }
 0x46c   : > { %746 = vrot.lane.b32.xlu2 %v743_v36, %s2529_s16  ;;  %vm854_vm6 = vcmp.lt.s32.totalorder %v2770_v35, %v2655_v34  ;;  %v2346_v35 = vld [vmem:[%s3144_s4 + $0x8] sm:$0xff] }
 0x4a7   : > { %v664_v37 = vpop.permute.xlu2 %663 }
 0x4a8   : > { %666 = vst.msk [vmem:[#allocation2 + $0x8] sm:$0xff] %vm512_vm1, %v664_v37 }
 0x4af   : > { %v755_v40 = vld [vmem:[#allocation2 + $0x8] sm:$0xff] }
 0x4b0   : > { %758 = vrot.lane.b32.xlu0 %v755_v40, %s2529_s16 }
 0x4b8   : > { %751 = vrot.lane.b32.xlu0 %v744_v44, %s2531_s20  ;;  %v2335_v44 = vld [vmem:[%s3145_s5] sm:$0xff] }
 0x4be   : > { %v818_v15 = vpop.permute.xlu1 %817 }
 0x4c6   : > { %v747_v47 = vpop.permute.xlu2 %746 }
 0x4c7   : > { %749 = vst.msk [vmem:[#allocation2] sm:$0xff] %vm512_vm1, %v747_v47 }
 0x4ce   : > { %v855_v48 = vld [vmem:[#allocation2] sm:$0xff] }
 0x4cf   : > { %v859_v49 = vpack.c.bf16 %v855_v48, %v855_v48 }
 0x4d1   : > { %2153 = vmatmul.msk.bf16.vlgmr.msrb.gmra.mxu3 %vm512_vm1, %v859_v49 }
 0x522   : > { %v759_v50 = vpop.permute.xlu0 %758 }
 0x523   : > { %v761_v51 = vsel %vm512_vm1, %v747_v47, %v759_v50 }
 0x524   : > { %v762_v52 = vpack.c.bf16 %v761_v51, %v761_v51 }
 0x526   : > { %2144 = vmatmul.msk.bf16.vlgmr.msrb.gmra.mxu1 %vm614_vm4, %v762_v52 }
 0x52a   : > { %v752_v53 = vpop.permute.xlu0 %751 }
 0x52b   : > { %754 = vst.msk [vmem:[#allocation3] sm:$0xff] %vm512_vm1, %v752_v53 }
 0x532   : > { %v856_v55 = vld [vmem:[#allocation3] sm:$0xff] }
 0x533   : > { %899 = vrot.lane.b32.xlu1 %v856_v55, %s2529_s16 }
 0x53b   : > { %837 = vrot.lane.b32.xlu1 %v755_v40, %s2531_s20  ;;  %v2338_v40 = vld [vmem:[%s3145_s5 + $0x18] sm:$0xff] }
 0x53c   : > { %982 = vmatpush.bf16.msrb.mxu2 %v2338_v40  ;;  %v2316_v40 = vld [vmem:[%s2610_s18 + $0x10] sm:$0xff] }
 0x53d   : > { %2090 = vmatmul.msk.bf16.gmra.mxu0 %vm431_vm2, %v2316_v40  ;;  %v2351_v40 = vld [vmem:[%s3144_s4] sm:$0xff] }
 0x540   : > { %983 = vmatpush.bf16.msrb.mxu2 %v2337_v41  ;;  %v2344_v41 = vld [vmem:[%s3145_s5 + $0x18] sm:$0xff] }
 0x541   : > { %1162 = vmatpush.bf16.msra.mxu3 %v2344_v41  ;;  %v2350_v41 = vld [vmem:[%s3145_s5 + $0x18] sm:$0xff] }
 0x542   : > { %1342 = vmatpush.bf16.msrb.mxu1 %v2350_v41  ;;  %v2356_v41 = vld [vmem:[%s3145_s5 + $0x18] sm:$0xff] }
 0x543   : > { %920 = vrot.lane.b32.xlu1 %v855_v48, %s2531_s20 }
 0x544   : > { %984 = vmatpush.bf16.msrb.mxu2 %v2336_v42  ;;  %v2343_v42 = vld [vmem:[%s3145_s5 + $0x10] sm:$0xff] }
 0x545   : > { %1163 = vmatpush.bf16.msra.mxu3 %v2343_v42  ;;  %v2349_v42 = vld [vmem:[%s3145_s5 + $0x10] sm:$0xff] }
 0x546   : > { %1343 = vmatpush.bf16.msrb.mxu1 %v2349_v42  ;;  %v2355_v42 = vld [vmem:[%s3145_s5 + $0x10] sm:$0xff] }
 0x548   : > { %985 = vmatpush.bf16.msrb.mxu2 %v2335_v44 }
 0x54c   : > { %1245 = vmatpush.bf16.msra.mxu2 %v2346_v35 }
 0x550   : > { %1246 = vmatpush.bf16.msra.mxu2 %v2345_v39 }
 0x554   : > { %v888_v58 = vpop.f32.mrf.mxu3 }
 0x555   : > { %v892_v59 = vadd.f32 %v888_v58, %v459_v57  ;;  %v461_v57 = vadd.f32 %v2634_v10, %v460_v56 }
 0x557   : > { %2422 = vtanh.f32 %v892_v59  ;;  %v893_v3 = vmul.f32 0.5, %v892_v59 }
 0x55c   : > { %v890_v60 = vpop.f32.mrf.mxu3 }
 0x55d   : > { %v2423_v61 = vpop.eup %2422 }
 0x55e   : > { %904 = vrot.lane.b32.xlu0 %v2423_v61, %s2528_s15 }
 0x5a3   : > { %v807_v62 = vpop.f32.mrf.mxu1 }
 0x5a4   : > { %v808_v63 = vadd.f32 %v2690_v54, %v807_v62 }
 0x5a5   : > { %v900_v20 = vpop.permute.xlu1 %899 }
 0x5a6   : > { %2424 = vtanh.f32 %v808_v63  ;;  %v811_v2 = vmul.f32 0.5, %v808_v63 }
 0x5a8   : > { %2426 = vtanh.f32 %v811_v2 }
 0x5a9   : > { %2428 = vtanh.f32 %v893_v3 }
 0x5ab   : > { %v809_v0 = vpop.f32.mrf.mxu1 }
 0x5ac   : > { %v2425_v1 = vpop.eup %2424 }
 0x5ad   : > { %822 = vrot.lane.b32.xlu2 %v2425_v1, %s2528_s15  ;;  %v838_v26 = vpop.permute.xlu1 %837 }
 0x5ae   : > { %v2427_v4 = vpop.eup %2426 }
 0x5af   : > { %v813_v5 = vmul.f32 0.5, %v2427_v4  ;;  %v2429_v7 = vpop.eup %2428 }
 0x5b0   : > { %v895_v11 = vmul.f32 0.5, %v2429_v7 }
 0x5b1   : > { %v814_v6 = vadd.f32 0.5, %v813_v5 }
 0x5b2   : > { %v896_v13 = vadd.f32 0.5, %v895_v11 }
 0x5b3   : > { %v820_v16 = vmul.f32 %v818_v15, %v814_v6 }
 0x5b4   : > { %v902_v21 = vmul.f32 %v900_v20, %v896_v13 }
 0x5b5   : > { %v921_v27 = vpop.permute.xlu1 %920 }
 0x5d0   : > { %v905_v12 = vpop.permute.xlu0 %904 }
 0x5d1   : > { %v907_v14 = vmul.f32 %v905_v12, %v896_v13 }
 0x607   : > { %v823_v8 = vpop.permute.xlu2 %822 }
 0x608   : > { %v825_v9 = vmul.f32 %v823_v8, %v814_v6 }
 0x60a   : > { %827 = vrot.lane.b32.xlu2 %v825_v9, %s2529_s16 }
 0x612   : > { %909 = vrot.lane.b32.xlu2 %v907_v14, %s2529_s16 }
 0x664   : > { %v828_v17 = vpop.permute.xlu2 %827 }
 0x665   : > { %v830_v18 = vadd.f32 %v828_v17, %v820_v16 }
 0x667   : > { %2430 = vtanh.f32 %v830_v18  ;;  %v841_v19 = vsel %vm674_vm5, %v830_v18, %v818_v15 }
 0x668   : > { %848 = vrot.lane.b32.xlu1 %v841_v19, %s2531_s20 }
 0x66c   : > { %v910_v22 = vpop.permute.xlu2 %909 }
 0x66d   : > { %v2431_v23 = vpop.eup %2430  ;;  %v912_v24 = vadd.f32 %v910_v22, %v902_v21 }
 0x66e   : > { %833 = vrot.lane.b32.xlu0 %v2431_v23, %s2528_s15 }
 0x66f   : > { %2432 = vtanh.f32 %v912_v24  ;;  %v924_v47 = vsel %vm854_vm6, %v912_v24, %v900_v20 }
 0x675   : > { %v2433_v25 = vpop.eup %2432 }
 0x676   : > { %915 = vrot.lane.b32.xlu0 %v2433_v25, %s2528_s15 }
 0x6da   : > { %v849_v28 = vpop.permute.xlu1 %848 }
 0x6db   : > { %851 = vst.msk [vmem:[#allocation3 + $0x8] sm:$0xff] %vm512_vm1, %v849_v28 }
 0x6e0   : > { %v834_v29 = vpop.permute.xlu0 %833 }
 0x6e1   : > { %v836_v30 = vmul.f32 %v834_v29, %v814_v6 }
 0x6e2   : > { %v936_v31 = vld [vmem:[#allocation3 + $0x8] sm:$0xff] }
 0x6e3   : > { %997 = vrot.lane.b32.xlu1 %v936_v31, %s2529_s16  ;;  %v840_v33 = vsel %vm674_vm5, %v836_v30, %v838_v26 }
 0x6e4   : > { %843 = vrot.lane.b32.xlu2 %v840_v33, %s2529_s16 }
 0x6e8   : > { %v916_v36 = vpop.permute.xlu0 %915 }
 0x6e9   : > { %v918_v37 = vmul.f32 %v916_v36, %v896_v13  ;;  %v2829_v36 = vstv %s1032_s25 }
 0x6ea   : > { %vm1034_vm7 = vcmp.lt.s32.totalorder %v2829_v36, %v2655_v34  ;;  %v2352_v36 = vld [vmem:[%s3144_s4 + $0x8] sm:$0xff] }
 0x6eb   : > { %v923_v38 = vsel %vm854_vm6, %v918_v37, %v921_v27 }
 0x6ec   : > { %926 = vrot.lane.b32.xlu2 %v923_v38, %s2529_s16 }
 0x73e   : > { %v844_v43 = vpop.permute.xlu2 %843 }
 0x73f   : > { %846 = vst.msk [vmem:[#allocation2 + $0x8] sm:$0xff] %vm512_vm1, %v844_v43  ;;  %v2342_v43 = vld [vmem:[%s3145_s5 + $0x8] sm:$0xff] }
 0x740   : > { %1164 = vmatpush.bf16.msra.mxu3 %v2342_v43  ;;  %v2348_v43 = vld [vmem:[%s3145_s5 + $0x8] sm:$0xff] }
 0x741   : > { %1344 = vmatpush.bf16.msrb.mxu1 %v2348_v43  ;;  %v2354_v43 = vld [vmem:[%s3145_s5 + $0x8] sm:$0xff] }
 0x746   : > { %v927_v45 = vpop.permute.xlu2 %926  ;;  %v935_v46 = vld [vmem:[#allocation2 + $0x8] sm:$0xff] }
 0x747   : > { %929 = vst.msk [vmem:[#allocation2] sm:$0xff] %vm512_vm1, %v927_v45  ;;  %938 = vrot.lane.b32.xlu0 %v935_v46, %s2529_s16 }
 0x74e   : > { %v1035_v48 = vld [vmem:[#allocation2] sm:$0xff] }
 0x74f   : > { %931 = vrot.lane.b32.xlu0 %v924_v47, %s2531_s20  ;;  %v1039_v49 = vpack.c.bf16 %v1035_v48, %v1035_v48 }
 0x751   : > { %2179 = vmatmul.msk.bf16.vlgmr.msra.gmra.mxu1 %vm512_vm1, %v1039_v49 }
 0x755   : > { %v998_v15 = vpop.permute.xlu1 %997 }
 0x7b9   : > { %v939_v50 = vpop.permute.xlu0 %938 }
 0x7ba   : > { %v941_v51 = vsel %vm512_vm1, %v927_v45, %v939_v50  ;;  %v2341_v45 = vld [vmem:[%s3145_s5] sm:$0xff] }
 0x7bb   : > { %v942_v52 = vpack.c.bf16 %v941_v51, %v941_v51  ;;  %1165 = vmatpush.bf16.msra.mxu3 %v2341_v45  ;;  %v2347_v45 = vld [vmem:[%s3145_s5] sm:$0xff] }
 0x7bc   : > { %1345 = vmatpush.bf16.msrb.mxu1 %v2347_v45  ;;  %v2353_v45 = vld [vmem:[%s3145_s5] sm:$0xff] }
 0x7bd   : > { %2170 = vmatmul.msk.bf16.vlgmr.msrb.gmra.mxu2 %vm614_vm4, %v942_v52 }
 0x7be   : > { %1522 = vmatpush.bf16.msrb.mxu2 %v2356_v41  ;;  %v2361_v41 = vld [vmem:[%s3145_s5 + $0x10] sm:$0xff] }
 0x7bf   : > { %1425 = vmatpush.bf16.msrb.mxu3 %v2352_v36  ;;  %v2317_v36 = vld [vmem:[%s2610_s18 + $0x18] sm:$0xff] }
 0x7c0   : > { %2091 = vmatmul.msk.bf16.gmra.mxu0 %vm431_vm2, %v2317_v36  ;;  %v2363_v36 = vld [vmem:[%s3144_s4] sm:$0xff] }
 0x7c1   : > { %v932_v53 = vpop.permute.xlu0 %931 }
 0x7c2   : > { %934 = vst.msk [vmem:[#allocation3] sm:$0xff] %vm512_vm1, %v932_v53  ;;  %1523 = vmatpush.bf16.msrb.mxu2 %v2355_v42  ;;  %v2360_v42 = vld [vmem:[%s3145_s5 + $0x8] sm:$0xff] }
 0x7c3   : > { %1426 = vmatpush.bf16.msrb.mxu3 %v2351_v40  ;;  %v2357_v40 = vld [vmem:[%s3144_s4] sm:$0xff] }
 0x7c6   : > { %1524 = vmatpush.bf16.msrb.mxu2 %v2354_v43 }
 0x7c9   : > { %v1036_v55 = vld [vmem:[#allocation3] sm:$0xff] }
 0x7ca   : > { %1079 = vrot.lane.b32.xlu1 %v1036_v55, %s2529_s16  ;;  %1525 = vmatpush.bf16.msrb.mxu2 %v2353_v45 }
 0x7ce   : > { %v1068_v58 = vpop.f32.mrf.mxu1 }
 0x7cf   : > { %v1072_v59 = vadd.f32 %v1068_v58, %v461_v57  ;;  %v463_v57 = vpop.f32.mrf.mxu0 }
 0x7d0   : > { %v464_v58 = vadd.f32 %v2634_v10, %v463_v57 }
 0x7d1   : > { %2434 = vtanh.f32 %v1072_v59  ;;  %v1073_v3 = vmul.f32 0.5, %v1072_v59 }
 0x7d2   : > { %1017 = vrot.lane.b32.xlu1 %v935_v46, %s2531_s20 }
 0x7d6   : > { %v1070_v60 = vpop.f32.mrf.mxu1 }
 0x7d7   : > { %v2435_v61 = vpop.eup %2434  ;;  %v465_v57 = vpop.f32.mrf.mxu0 }
 0x7d8   : > { %1084 = vrot.lane.b32.xlu0 %v2435_v61, %s2528_s15 }
 0x7da   : > { %1100 = vrot.lane.b32.xlu1 %v1035_v48, %s2531_s20 }
 0x83c   : > { %v1080_v20 = vpop.permute.xlu1 %1079 }
 0x840   : > { %v987_v62 = vpop.f32.mrf.mxu2 }
 0x841   : > { %v988_v63 = vadd.f32 %v2690_v54, %v987_v62 }
 0x843   : > { %2436 = vtanh.f32 %v988_v63  ;;  %v991_v2 = vmul.f32 0.5, %v988_v63 }
 0x844   : > { %v1018_v26 = vpop.permute.xlu1 %1017 }
 0x845   : > { %2438 = vtanh.f32 %v991_v2 }
 0x846   : > { %2440 = vtanh.f32 %v1073_v3 }
 0x848   : > { %v989_v0 = vpop.f32.mrf.mxu2 }
 0x849   : > { %v2437_v1 = vpop.eup %2436 }
 0x84a   : > { %1002 = vrot.lane.b32.xlu2 %v2437_v1, %s2528_s15  ;;  %v1085_v12 = vpop.permute.xlu0 %1084 }
 0x84b   : > { %v2439_v4 = vpop.eup %2438 }
 0x84c   : > { %v993_v5 = vmul.f32 0.5, %v2439_v4  ;;  %v2441_v7 = vpop.eup %2440  ;;  %v1101_v27 = vpop.permute.xlu1 %1100 }
 0x84d   : > { %v1075_v11 = vmul.f32 0.5, %v2441_v7 }
 0x84e   : > { %v994_v6 = vadd.f32 0.5, %v993_v5 }
 0x84f   : > { %v1076_v13 = vadd.f32 0.5, %v1075_v11 }
 0x850   : > { %v1000_v16 = vmul.f32 %v998_v15, %v994_v6 }
 0x851   : > { %v1087_v14 = vmul.f32 %v1085_v12, %v1076_v13  ;;  %v1082_v21 = vmul.f32 %v1080_v20, %v1076_v13 }
 0x8a4   : > { %v1003_v8 = vpop.permute.xlu2 %1002 }
 0x8a5   : > { %v1005_v9 = vmul.f32 %v1003_v8, %v994_v6 }
 0x8a7   : > { %1007 = vrot.lane.b32.xlu2 %v1005_v9, %s2529_s16 }
 0x8af   : > { %1089 = vrot.lane.b32.xlu2 %v1087_v14, %s2529_s16 }
 0x901   : > { %v1008_v17 = vpop.permute.xlu2 %1007 }
 0x902   : > { %v1010_v18 = vadd.f32 %v1008_v17, %v1000_v16 }
 0x904   : > { %2442 = vtanh.f32 %v1010_v18  ;;  %v1021_v19 = vsel %vm854_vm6, %v1010_v18, %v998_v15 }
 0x905   : > { %1028 = vrot.lane.b32.xlu1 %v1021_v19, %s2531_s20 }
 0x909   : > { %v1090_v22 = vpop.permute.xlu2 %1089 }
 0x90a   : > { %v2443_v23 = vpop.eup %2442  ;;  %v1092_v24 = vadd.f32 %v1090_v22, %v1082_v21 }
 0x90b   : > { %1013 = vrot.lane.b32.xlu0 %v2443_v23, %s2528_s15 }
 0x90c   : > { %2444 = vtanh.f32 %v1092_v24  ;;  %v1104_v48 = vsel %vm1034_vm7, %v1092_v24, %v1080_v20 }
 0x912   : > { %v2445_v25 = vpop.eup %2444 }
 0x913   : > { %1095 = vrot.lane.b32.xlu0 %v2445_v25, %s2528_s15 }
 0x977   : > { %v1029_v28 = vpop.permute.xlu1 %1028 }
 0x978   : > { %1031 = vst.msk [vmem:[#allocation3 + $0x8] sm:$0xff] %vm512_vm1, %v1029_v28 }
 0x97d   : > { %v1014_v29 = vpop.permute.xlu0 %1013 }
 0x97e   : > { %v1016_v30 = vmul.f32 %v1014_v29, %v994_v6 }
 0x97f   : > { %v1116_v31 = vld [vmem:[#allocation3 + $0x8] sm:$0xff] }
 0x980   : > { %1177 = vrot.lane.b32.xlu1 %v1116_v31, %s2529_s16  ;;  %v1020_v33 = vsel %vm854_vm6, %v1016_v30, %v1018_v26 }
 0x981   : > { %1023 = vrot.lane.b32.xlu2 %v1020_v33, %s2529_s16 }
 0x985   : > { %v1096_v37 = vpop.permute.xlu0 %1095 }
 0x986   : > { %v1098_v38 = vmul.f32 %v1096_v37, %v1076_v13 }
 0x988   : > { %v1103_v32 = vsel %vm1034_vm7, %v1098_v38, %v1101_v27  ;;  %v2890_v38 = vstv %s1212_s26 }
 0x989   : > { %1106 = vrot.lane.b32.xlu2 %v1103_v32, %s2529_s16  ;;  %vm1214_vm8 = vcmp.lt.s32.totalorder %v2890_v38, %v2655_v34  ;;  %v2358_v38 = vld [vmem:[%s3144_s4 + $0x8] sm:$0xff] }
 0x98a   : > { %1605 = vmatpush.bf16.msra.mxu1 %v2358_v38 }
 0x98e   : > { %1606 = vmatpush.bf16.msra.mxu1 %v2357_v40  ;;  %v2362_v40 = vld [vmem:[%s3145_s5 + $0x18] sm:$0xff] }
 0x9db   : > { %v1024_v44 = vpop.permute.xlu2 %1023 }
 0x9dc   : > { %1026 = vst.msk [vmem:[#allocation2 + $0x8] sm:$0xff] %vm512_vm1, %v1024_v44 }
 0x9e3   : > { %v1107_v46 = vpop.permute.xlu2 %1106  ;;  %v1115_v47 = vld [vmem:[#allocation2 + $0x8] sm:$0xff] }
 0x9e4   : > { %1109 = vst.msk [vmem:[#allocation2] sm:$0xff] %vm512_vm1, %v1107_v46  ;;  %1118 = vrot.lane.b32.xlu0 %v1115_v47, %s2529_s16 }
 0x9eb   : > { %v1215_v49 = vld [vmem:[#allocation2] sm:$0xff] }
 0x9ec   : > { %1111 = vrot.lane.b32.xlu0 %v1104_v48, %s2531_s20  ;;  %v1219_v50 = vpack.c.bf16 %v1215_v49, %v1215_v49 }
 0x9ee   : > { %2205 = vmatmul.msk.bf16.vlgmr.msra.gmra.mxu2 %vm512_vm1, %v1219_v50 }
 0x9f2   : > { %v1178_v16 = vpop.permute.xlu1 %1177 }
 0xa56   : > { %v1119_v51 = vpop.permute.xlu0 %1118 }
 0xa57   : > { %v1121_v52 = vsel %vm512_vm1, %v1107_v46, %v1119_v51 }
 0xa58   : > { %v1122_v53 = vpack.c.bf16 %v1121_v52, %v1121_v52 }
 0xa5a   : > { %2196 = vmatmul.msk.bf16.vlgmr.msra.gmra.mxu3 %vm614_vm4, %v1122_v53 }
 0xa5b   : > { %1702 = vmatpush.bf16.msra.mxu3 %v2362_v40  ;;  %v2365_v40 = vld [vmem:[%s3145_s5] sm:$0xff] }
 0xa5e   : > { %v1112_v55 = vpop.permute.xlu0 %1111 }
 0xa5f   : > { %1114 = vst.msk [vmem:[#allocation3] sm:$0xff] %vm512_vm1, %v1112_v55  ;;  %1703 = vmatpush.bf16.msra.mxu3 %v2361_v41 }
 0xa63   : > { %1704 = vmatpush.bf16.msra.mxu3 %v2360_v42 }
 0xa66   : > { %v1216_v56 = vld [vmem:[#allocation3] sm:$0xff] }
 0xa67   : > { %1259 = vrot.lane.b32.xlu1 %v1216_v56, %s2529_s16 }
 0xa6f   : > { %1197 = vrot.lane.b32.xlu1 %v1115_v47, %s2531_s20 }
 0xa71   : > { %v1248_v59 = vpop.f32.mrf.mxu2 }
 0xa72   : > { %v1252_v60 = vadd.f32 %v1248_v59, %v464_v58  ;;  %v466_v58 = vadd.f32 %v2634_v10, %v465_v57 }
 0xa74   : > { %2446 = vtanh.f32 %v1252_v60  ;;  %v1253_v4 = vmul.f32 0.5, %v1252_v60 }
 0xa77   : > { %1280 = vrot.lane.b32.xlu1 %v1215_v49, %s2531_s20 }
 0xa79   : > { %v1250_v61 = vpop.f32.mrf.mxu2 }
 0xa7a   : > { %v2447_v62 = vpop.eup %2446 }
 0xa7b   : > { %1264 = vrot.lane.b32.xlu0 %v2447_v62, %s2528_s15 }
 0xad9   : > { %v1260_v21 = vpop.permute.xlu1 %1259 }
 0xadd   : > { %v1167_v63 = vpop.f32.mrf.mxu3 }
 0xade   : > { %v1168_v0 = vadd.f32 %v2690_v54, %v1167_v63 }
 0xae0   : > { %2448 = vtanh.f32 %v1168_v0  ;;  %v1171_v3 = vmul.f32 0.5, %v1168_v0 }
 0xae1   : > { %v1198_v27 = vpop.permute.xlu1 %1197 }
 0xae2   : > { %2450 = vtanh.f32 %v1171_v3 }
 0xae3   : > { %2452 = vtanh.f32 %v1253_v4 }
 0xae5   : > { %v1169_v1 = vpop.f32.mrf.mxu3 }
 0xae6   : > { %v2449_v2 = vpop.eup %2448 }
 0xae7   : > { %1182 = vrot.lane.b32.xlu2 %v2449_v2, %s2528_s15 }
 0xae8   : > { %v2451_v5 = vpop.eup %2450 }
 0xae9   : > { %v1173_v6 = vmul.f32 0.5, %v2451_v5  ;;  %v2453_v8 = vpop.eup %2452  ;;  %v1281_v28 = vpop.permute.xlu1 %1280 }
 0xaea   : > { %v1255_v12 = vmul.f32 0.5, %v2453_v8 }
 0xaeb   : > { %v1174_v7 = vadd.f32 0.5, %v1173_v6 }
 0xaec   : > { %v1256_v14 = vadd.f32 0.5, %v1255_v12 }
 0xaed   : > { %v1265_v13 = vpop.permute.xlu0 %1264  ;;  %v1180_v17 = vmul.f32 %v1178_v16, %v1174_v7 }
 0xaee   : > { %v1267_v15 = vmul.f32 %v1265_v13, %v1256_v14  ;;  %v1262_v22 = vmul.f32 %v1260_v21, %v1256_v14 }
 0xb41   : > { %v1183_v9 = vpop.permute.xlu2 %1182 }
 0xb42   : > { %v1185_v11 = vmul.f32 %v1183_v9, %v1174_v7 }
 0xb44   : > { %1187 = vrot.lane.b32.xlu2 %v1185_v11, %s2529_s16 }
 0xb4c   : > { %1269 = vrot.lane.b32.xlu2 %v1267_v15, %s2529_s16 }
 0xb9e   : > { %v1188_v18 = vpop.permute.xlu2 %1187 }
 0xb9f   : > { %v1190_v19 = vadd.f32 %v1188_v18, %v1180_v17 }
 0xba1   : > { %2454 = vtanh.f32 %v1190_v19  ;;  %v1201_v20 = vsel %vm1034_vm7, %v1190_v19, %v1178_v16 }
 0xba2   : > { %1208 = vrot.lane.b32.xlu1 %v1201_v20, %s2531_s20 }
 0xba6   : > { %v1270_v23 = vpop.permute.xlu2 %1269 }
 0xba7   : > { %v2455_v24 = vpop.eup %2454  ;;  %v1272_v25 = vadd.f32 %v1270_v23, %v1262_v22 }
 0xba8   : > { %1193 = vrot.lane.b32.xlu0 %v2455_v24, %s2528_s15 }
 0xba9   : > { %2456 = vtanh.f32 %v1272_v25  ;;  %v1284_v48 = vsel %vm1214_vm8, %v1272_v25, %v1260_v21 }
 0xbaf   : > { %v2457_v26 = vpop.eup %2456 }
 0xbb0   : > { %1275 = vrot.lane.b32.xlu0 %v2457_v26, %s2528_s15 }
 0xc14   : > { %v1209_v29 = vpop.permute.xlu1 %1208 }
 0xc15   : > { %1211 = vst.msk [vmem:[#allocation3 + $0x8] sm:$0xff] %vm512_vm1, %v1209_v29 }
 0xc1a   : > { %v1194_v30 = vpop.permute.xlu0 %1193 }
 0xc1b   : > { %v1196_v31 = vmul.f32 %v1194_v30, %v1174_v7 }
 0xc1c   : > { %v1296_v33 = vld [vmem:[#allocation3 + $0x8] sm:$0xff] }
 0xc1d   : > { %1357 = vrot.lane.b32.xlu1 %v1296_v33, %s2529_s16  ;;  %v1200_v37 = vsel %vm1034_vm7, %v1196_v31, %v1198_v27 }
 0xc1e   : > { %1203 = vrot.lane.b32.xlu2 %v1200_v37, %s2529_s16  ;;  %v2949_v37 = vstv %s1392_s27 }
 0xc1f   : > { %vm1394_vm9 = vcmp.lt.s32.totalorder %v2949_v37, %v2655_v34  ;;  %v2364_v37 = vld [vmem:[%s3144_s4 + $0x8] sm:$0xff] }
 0xc20   : > { %1785 = vmatpush.bf16.msrb.mxu0 %v2364_v37  ;;  %v2366_v37 = vld [vmem:[%s3145_s5 + $0x8] sm:$0xff] }
 0xc22   : > { %v1276_v32 = vpop.permute.xlu0 %1275 }
 0xc23   : > { %v1278_v35 = vmul.f32 %v1276_v32, %v1256_v14 }
 0xc24   : > { %1786 = vmatpush.bf16.msrb.mxu0 %v2363_v36 }
 0xc25   : > { %v1283_v39 = vsel %vm1214_vm8, %v1278_v35, %v1281_v28 }
 0xc26   : > { %1286 = vrot.lane.b32.xlu2 %v1283_v39, %s2529_s16 }
 0xc78   : > { %v1204_v44 = vpop.permute.xlu2 %1203 }
 0xc79   : > { %1206 = vst.msk [vmem:[#allocation2 + $0x8] sm:$0xff] %vm512_vm1, %v1204_v44 }
 0xc80   : > { %v1287_v46 = vpop.permute.xlu2 %1286  ;;  %v1295_v47 = vld [vmem:[#allocation2 + $0x8] sm:$0xff] }
 0xc81   : > { %1289 = vst.msk [vmem:[#allocation2] sm:$0xff] %vm512_vm1, %v1287_v46  ;;  %1298 = vrot.lane.b32.xlu0 %v1295_v47, %s2529_s16 }
 0xc88   : > { %v1395_v49 = vld [vmem:[#allocation2] sm:$0xff] }
 0xc89   : > { %1291 = vrot.lane.b32.xlu0 %v1284_v48, %s2531_s20  ;;  %v1399_v50 = vpack.c.bf16 %v1395_v49, %v1395_v49 }
 0xc8b   : > { %2231 = vmatmul.msk.bf16.vlgmr.msrb.gmra.mxu3 %vm512_vm1, %v1399_v50 }
 0xc8f   : > { %v1358_v15 = vpop.permute.xlu1 %1357 }
 0xcf3   : > { %v1299_v51 = vpop.permute.xlu0 %1298 }
 0xcf4   : > { %v1301_v52 = vsel %vm512_vm1, %v1287_v46, %v1299_v51 }
 0xcf5   : > { %v1302_v53 = vpack.c.bf16 %v1301_v52, %v1301_v52 }
 0xcf7   : > { %2222 = vmatmul.msk.bf16.vlgmr.msrb.gmra.mxu1 %vm614_vm4, %v1302_v53 }
 0xcfb   : > { %v1292_v55 = vpop.permute.xlu0 %1291 }
 0xcfc   : > { %1294 = vst.msk [vmem:[#allocation3] sm:$0xff] %vm512_vm1, %v1292_v55 }
 0xd03   : > { %v1396_v56 = vld [vmem:[#allocation3] sm:$0xff] }
 0xd04   : > { %1439 = vrot.lane.b32.xlu1 %v1396_v56, %s2529_s16  ;;  %v468_v56 = vpop.f32.mrf.mxu0 }
 0xd0c   : > { %1377 = vrot.lane.b32.xlu1 %v1295_v47, %s2531_s20 }
 0xd0e   : > { %v1428_v59 = vpop.f32.mrf.mxu3 }
 0xd0f   : > { %v1432_v60 = vadd.f32 %v1428_v59, %v466_v58  ;;  %v2992_v58 = vld [vmem:[%s3143_s3] ss:$0 sm:$0xff] }
 0xd10   : > { %v469_v59 = vadd.f32 %v2992_v58, %v468_v56 }
 0xd11   : > { %2458 = vtanh.f32 %v1432_v60  ;;  %v1433_v10 = vmul.f32 0.5, %v1432_v60 }
 0xd14   : > { %1460 = vrot.lane.b32.xlu1 %v1395_v49, %s2531_s20 }
 0xd16   : > { %v1430_v61 = vpop.f32.mrf.mxu3 }
 0xd17   : > { %v2459_v62 = vpop.eup %2458 }
 0xd18   : > { %1444 = vrot.lane.b32.xlu0 %v2459_v62, %s2528_s15 }
 0xd74   : > { %v1347_v63 = vpop.f32.mrf.mxu1 }
 0xd75   : > { %v1348_v0 = vadd.f32 %v2690_v54, %v1347_v63 }
 0xd76   : > { %v1440_v20 = vpop.permute.xlu1 %1439 }
 0xd77   : > { %2460 = vtanh.f32 %v1348_v0  ;;  %v1351_v3 = vmul.f32 0.5, %v1348_v0 }
 0xd79   : > { %2462 = vtanh.f32 %v1351_v3 }
 0xd7a   : > { %2464 = vtanh.f32 %v1433_v10 }
 0xd7c   : > { %v1349_v1 = vpop.f32.mrf.mxu1 }
 0xd7d   : > { %v2461_v2 = vpop.eup %2460 }
 0xd7e   : > { %1362 = vrot.lane.b32.xlu2 %v2461_v2, %s2528_s15  ;;  %v1378_v26 = vpop.permute.xlu1 %1377 }
 0xd7f   : > { %v2463_v4 = vpop.eup %2462 }
 0xd80   : > { %v1353_v5 = vmul.f32 0.5, %v2463_v4  ;;  %v2465_v7 = vpop.eup %2464 }
 0xd81   : > { %v1435_v11 = vmul.f32 0.5, %v2465_v7 }
 0xd82   : > { %v1354_v6 = vadd.f32 0.5, %v1353_v5 }
 0xd83   : > { %v1436_v13 = vadd.f32 0.5, %v1435_v11 }
 0xd84   : > { %v1360_v16 = vmul.f32 %v1358_v15, %v1354_v6 }
 0xd85   : > { %v1442_v21 = vmul.f32 %v1440_v20, %v1436_v13 }
 0xd86   : > { %v1461_v27 = vpop.permute.xlu1 %1460 }
 0xd8a   : > { %v1445_v12 = vpop.permute.xlu0 %1444 }
 0xd8b   : > { %v1447_v14 = vmul.f32 %v1445_v12, %v1436_v13 }
 0xdd8   : > { %v1363_v8 = vpop.permute.xlu2 %1362 }
 0xdd9   : > { %v1365_v9 = vmul.f32 %v1363_v8, %v1354_v6 }
 0xddb   : > { %1367 = vrot.lane.b32.xlu2 %v1365_v9, %s2529_s16 }
 0xde3   : > { %1449 = vrot.lane.b32.xlu2 %v1447_v14, %s2529_s16 }
 0xe35   : > { %v1368_v17 = vpop.permute.xlu2 %1367 }
 0xe36   : > { %v1370_v18 = vadd.f32 %v1368_v17, %v1360_v16 }
 0xe38   : > { %2466 = vtanh.f32 %v1370_v18  ;;  %v1381_v19 = vsel %vm1214_vm8, %v1370_v18, %v1358_v15 }
 0xe39   : > { %1388 = vrot.lane.b32.xlu1 %v1381_v19, %s2531_s20 }
 0xe3d   : > { %v1450_v22 = vpop.permute.xlu2 %1449 }
 0xe3e   : > { %v2467_v23 = vpop.eup %2466  ;;  %v1452_v24 = vadd.f32 %v1450_v22, %v1442_v21 }
 0xe3f   : > { %1373 = vrot.lane.b32.xlu0 %v2467_v23, %s2528_s15 }
 0xe40   : > { %2468 = vtanh.f32 %v1452_v24  ;;  %v1464_v48 = vsel %vm1394_vm9, %v1452_v24, %v1440_v20 }
 0xe46   : > { %v2469_v25 = vpop.eup %2468 }
 0xe47   : > { %1455 = vrot.lane.b32.xlu0 %v2469_v25, %s2528_s15 }
 0xeab   : > { %v1389_v28 = vpop.permute.xlu1 %1388 }
 0xeac   : > { %1391 = vst.msk [vmem:[#allocation3 + $0x8] sm:$0xff] %vm512_vm1, %v1389_v28 }
 0xeb1   : > { %v1374_v29 = vpop.permute.xlu0 %1373 }
 0xeb2   : > { %v1376_v30 = vmul.f32 %v1374_v29, %v1354_v6 }
 0xeb3   : > { %v1476_v31 = vld [vmem:[#allocation3 + $0x8] sm:$0xff] }
 0xeb4   : > { %1537 = vrot.lane.b32.xlu1 %v1476_v31, %s2529_s16  ;;  %v1380_v33 = vsel %vm1214_vm8, %v1376_v30, %v1378_v26 }
 0xeb5   : > { %1383 = vrot.lane.b32.xlu2 %v1380_v33, %s2529_s16 }
 0xeb9   : > { %v1456_v32 = vpop.permute.xlu0 %1455 }
 0xeba   : > { %v1458_v35 = vmul.f32 %v1456_v32, %v1436_v13  ;;  %v3015_v32 = vstv %s1572_s29 }
 0xebb   : > { %vm1574_vm10 = vcmp.lt.s32.totalorder %v3015_v32, %v2655_v34  ;;  %v2367_v32 = vld [vmem:[%s3145_s5 + $0x10] sm:$0xff] }
 0xebc   : > { %v1463_v39 = vsel %vm1394_vm9, %v1458_v35, %v1461_v27 }
 0xebd   : > { %1466 = vrot.lane.b32.xlu2 %v1463_v39, %s2529_s16 }
 0xf0f   : > { %v1384_v44 = vpop.permute.xlu2 %1383 }
 0xf10   : > { %1386 = vst.msk [vmem:[#allocation2 + $0x8] sm:$0xff] %vm512_vm1, %v1384_v44  ;;  %v2359_v44 = vld [vmem:[%s3145_s5] sm:$0xff] }
 0xf11   : > { %1705 = vmatpush.bf16.msra.mxu3 %v2359_v44 }
 0xf17   : > { %v1467_v46 = vpop.permute.xlu2 %1466  ;;  %v1475_v47 = vld [vmem:[#allocation2 + $0x8] sm:$0xff] }
 0xf18   : > { %1469 = vst.msk [vmem:[#allocation2] sm:$0xff] %vm512_vm1, %v1467_v46  ;;  %1478 = vrot.lane.b32.xlu0 %v1475_v47, %s2529_s16 }
 0xf1f   : > { %v1575_v49 = vld [vmem:[#allocation2] sm:$0xff] }
 0xf20   : > { %1471 = vrot.lane.b32.xlu0 %v1464_v48, %s2531_s20  ;;  %v1579_v50 = vpack.c.bf16 %v1575_v49, %v1575_v49 }
 0xf22   : > { %2257 = vmatmul.msk.bf16.vlgmr.msra.gmra.mxu1 %vm512_vm1, %v1579_v50 }
 0xf26   : > { %v1538_v15 = vpop.permute.xlu1 %1537 }
 0xf8a   : > { %v1479_v51 = vpop.permute.xlu0 %1478 }
 0xf8b   : > { %v1481_v52 = vsel %vm512_vm1, %v1467_v46, %v1479_v51 }
 0xf8c   : > { %v1482_v53 = vpack.c.bf16 %v1481_v52, %v1481_v52 }
 0xf8e   : > { %2248 = vmatmul.msk.bf16.vlgmr.msrb.gmra.mxu2 %vm614_vm4, %v1482_v53 }
 0xf92   : > { %v1472_v55 = vpop.permute.xlu0 %1471 }
 0xf93   : > { %1474 = vst.msk [vmem:[#allocation3] sm:$0xff] %vm512_vm1, %v1472_v55  ;;  %v470_v55 = vpop.f32.mrf.mxu0 }
 0xf9a   : > { %v1576_v57 = vld [vmem:[#allocation3] sm:$0xff] }
 0xf9b   : > { %1619 = vrot.lane.b32.xlu1 %v1576_v57, %s2529_s16  ;;  %v471_v57 = vadd.f32 %v2992_v58, %v470_v55 }
 0xf9f   : > { %v1608_v60 = vpop.f32.mrf.mxu1 }
 0xfa0   : > { %v1612_v61 = vadd.f32 %v1608_v60, %v469_v59 }
 0xfa2   : > { %2470 = vtanh.f32 %v1612_v61  ;;  %v1613_v4 = vmul.f32 0.5, %v1612_v61 }
 0xfa3   : > { %1557 = vrot.lane.b32.xlu1 %v1475_v47, %s2531_s20 }
 0xfa7   : > { %v1610_v62 = vpop.f32.mrf.mxu1 }
 0xfa8   : > { %v2471_v63 = vpop.eup %2470 }
 0xfa9   : > { %1624 = vrot.lane.b32.xlu0 %v2471_v63, %s2528_s15 }
 0xfab   : > { %1640 = vrot.lane.b32.xlu1 %v1575_v49, %s2531_s20 }
0x100d   : > { %v1620_v20 = vpop.permute.xlu1 %1619 }
0x1011   : > { %v1527_v0 = vpop.f32.mrf.mxu2 }
0x1012   : > { %v1528_v1 = vadd.f32 %v2690_v54, %v1527_v0  ;;  %v3060_v0 = vld [vmem:[%s3146_s6] ss:$0 sm:$0xff] }
0x1014   : > { %2472 = vtanh.f32 %v1528_v1  ;;  %v1531_v10 = vmul.f32 0.5, %v1528_v1 }
0x1015   : > { %v1558_v26 = vpop.permute.xlu1 %1557 }
0x1016   : > { %2474 = vtanh.f32 %v1531_v10 }
0x1017   : > { %2476 = vtanh.f32 %v1613_v4 }
0x1019   : > { %v1529_v2 = vpop.f32.mrf.mxu2 }
0x101a   : > { %v2473_v3 = vpop.eup %2472 }
0x101b   : > { %1542 = vrot.lane.b32.xlu2 %v2473_v3, %s2528_s15  ;;  %v1625_v13 = vpop.permute.xlu0 %1624 }
0x101c   : > { %v2475_v5 = vpop.eup %2474 }
0x101d   : > { %v1533_v6 = vmul.f32 0.5, %v2475_v5  ;;  %v2477_v8 = vpop.eup %2476  ;;  %v1641_v27 = vpop.permute.xlu1 %1640 }
0x101e   : > { %v1615_v12 = vmul.f32 0.5, %v2477_v8 }
0x101f   : > { %v1534_v7 = vadd.f32 0.5, %v1533_v6 }
0x1020   : > { %v1616_v54 = vadd.f32 0.5, %v1615_v12 }
0x1021   : > { %v1540_v16 = vmul.f32 %v1538_v15, %v1534_v7 }
0x1022   : > { %v1627_v14 = vmul.f32 %v1625_v13, %v1616_v54  ;;  %v1622_v21 = vmul.f32 %v1620_v20, %v1616_v54 }
0x1075   : > { %v1543_v9 = vpop.permute.xlu2 %1542 }
0x1076   : > { %v1545_v11 = vmul.f32 %v1543_v9, %v1534_v7 }
0x1078   : > { %1547 = vrot.lane.b32.xlu2 %v1545_v11, %s2529_s16 }
0x1080   : > { %1629 = vrot.lane.b32.xlu2 %v1627_v14, %s2529_s16 }
0x10d2   : > { %v1548_v17 = vpop.permute.xlu2 %1547 }
0x10d3   : > { %v1550_v18 = vadd.f32 %v1548_v17, %v1540_v16 }
0x10d5   : > { %2478 = vtanh.f32 %v1550_v18  ;;  %v1561_v19 = vsel %vm1394_vm9, %v1550_v18, %v1538_v15 }
0x10d6   : > { %1568 = vrot.lane.b32.xlu1 %v1561_v19, %s2531_s20 }
0x10da   : > { %v1630_v22 = vpop.permute.xlu2 %1629 }
0x10db   : > { %v2479_v23 = vpop.eup %2478  ;;  %v1632_v24 = vadd.f32 %v1630_v22, %v1622_v21 }
0x10dc   : > { %1553 = vrot.lane.b32.xlu0 %v2479_v23, %s2528_s15 }
0x10dd   : > { %2480 = vtanh.f32 %v1632_v24  ;;  %v1644_v47 = vsel %vm1574_vm10, %v1632_v24, %v1620_v20 }
0x10e3   : > { %v2481_v25 = vpop.eup %2480 }
0x10e4   : > { %1635 = vrot.lane.b32.xlu0 %v2481_v25, %s2528_s15 }
0x1148   : > { %v1569_v28 = vpop.permute.xlu1 %1568 }
0x1149   : > { %1571 = vst.msk [vmem:[#allocation3 + $0x8] sm:$0xff] %vm512_vm1, %v1569_v28 }
0x114e   : > { %v1554_v29 = vpop.permute.xlu0 %1553 }
0x114f   : > { %v1556_v30 = vmul.f32 %v1554_v29, %v1534_v7 }
0x1150   : > { %v1656_v31 = vld [vmem:[#allocation3 + $0x8] sm:$0xff] }
0x1151   : > { %1717 = vrot.lane.b32.xlu1 %v1656_v31, %s2529_s16  ;;  %v1560_v33 = vsel %vm1394_vm9, %v1556_v30, %v1558_v26  ;;  %v1753_v31 = vstv %s1752_s17 }
0x1152   : > { %1563 = vrot.lane.b32.xlu2 %v1560_v33, %s2529_s16  ;;  %vm1754_vm11 = vcmp.lt.s32.totalorder %v1753_v31, %v2655_v34 }
0x1156   : > { %v1636_v35 = vpop.permute.xlu0 %1635 }
0x1157   : > { %v1638_v39 = vmul.f32 %v1636_v35, %v1616_v54 }
0x1159   : > { %v1643_v38 = vsel %vm1574_vm10, %v1638_v39, %v1641_v27 }
0x115a   : > { %1646 = vrot.lane.b32.xlu2 %v1643_v38, %s2529_s16  ;;  %v2368_v38 = vld [vmem:[%s3145_s5 + $0x18] sm:$0xff] }
0x115b   : > { %1882 = vmatpush.bf16.msra.mxu2 %v2368_v38 }
0x115f   : > { %1883 = vmatpush.bf16.msra.mxu2 %v2367_v32 }
0x1163   : > { %1884 = vmatpush.bf16.msra.mxu2 %v2366_v37 }
0x1167   : > { %1885 = vmatpush.bf16.msra.mxu2 %v2365_v40 }
0x11ac   : > { %v1564_v43 = vpop.permute.xlu2 %1563 }
0x11ad   : > { %1566 = vst.msk [vmem:[#allocation2 + $0x8] sm:$0xff] %vm512_vm1, %v1564_v43 }
0x11b4   : > { %v1647_v45 = vpop.permute.xlu2 %1646  ;;  %v1655_v46 = vld [vmem:[#allocation2 + $0x8] sm:$0xff] }
0x11b5   : > { %1649 = vst.msk [vmem:[#allocation2] sm:$0xff] %vm512_vm1, %v1647_v45  ;;  %1658 = vrot.lane.b32.xlu0 %v1655_v46, %s2529_s16 }
0x11bc   : > { %v1755_v48 = vld [vmem:[#allocation2] sm:$0xff] }
0x11bd   : > { %1651 = vrot.lane.b32.xlu0 %v1644_v47, %s2531_s20  ;;  %v1759_v49 = vpack.c.bf16 %v1755_v48, %v1755_v48 }
0x11bf   : > { %2283 = vmatmul.msk.bf16.vlgmr.msrb.gmra.mxu0 %vm512_vm1, %v1759_v49 }
0x11c3   : > { %v1718_v14 = vpop.permute.xlu1 %1717 }
0x1227   : > { %v1659_v50 = vpop.permute.xlu0 %1658 }
0x1228   : > { %v1661_v51 = vsel %vm512_vm1, %v1647_v45, %v1659_v50 }
0x1229   : > { %v1662_v52 = vpack.c.bf16 %v1661_v51, %v1661_v51 }
0x122b   : > { %2274 = vmatmul.msk.bf16.vlgmr.msra.gmra.mxu3 %vm614_vm4, %v1662_v52 }
0x122f   : > { %v1652_v53 = vpop.permute.xlu0 %1651 }
0x1230   : > { %1654 = vst.msk [vmem:[#allocation3] sm:$0xff] %vm512_vm1, %v1652_v53 }
0x1237   : > { %v1756_v56 = vld [vmem:[#allocation3] sm:$0xff] }
0x1238   : > { %1799 = vrot.lane.b32.xlu1 %v1756_v56, %s2529_s16 }
0x123c   : > { %v1788_v59 = vpop.f32.mrf.mxu0 }
0x123d   : > { %v1792_v60 = vadd.f32 %v1788_v59, %v471_v57 }
0x123f   : > { %2482 = vtanh.f32 %v1792_v60  ;;  %v1793_v10 = vmul.f32 0.5, %v1792_v60 }
0x1240   : > { %1737 = vrot.lane.b32.xlu1 %v1655_v46, %s2531_s20 }
0x1244   : > { %v1790_v61 = vpop.f32.mrf.mxu0 }
0x1245   : > { %v2483_v62 = vpop.eup %2482 }
0x1246   : > { %1804 = vrot.lane.b32.xlu0 %v2483_v62, %s2528_s15 }
0x1248   : > { %1820 = vrot.lane.b32.xlu1 %v1755_v48, %s2531_s20 }
0x12aa   : > { %v1800_v19 = vpop.permute.xlu1 %1799 }
0x12ae   : > { %v1707_v63 = vpop.f32.mrf.mxu3 }
0x12af   : > { %v1708_v1 = vadd.f32 %v3060_v0, %v1707_v63 }
0x12b1   : > { %2484 = vtanh.f32 %v1708_v1  ;;  %v1711_v3 = vmul.f32 0.5, %v1708_v1 }
0x12b2   : > { %v1738_v25 = vpop.permute.xlu1 %1737 }
0x12b3   : > { %2486 = vtanh.f32 %v1711_v3 }
0x12b4   : > { %2488 = vtanh.f32 %v1793_v10 }
0x12b6   : > { %v1709_v58 = vpop.f32.mrf.mxu3 }
0x12b7   : > { %v2485_v2 = vpop.eup %2484 }
0x12b8   : > { %1722 = vrot.lane.b32.xlu2 %v2485_v2, %s2528_s15  ;;  %v1805_v12 = vpop.permute.xlu0 %1804 }
0x12b9   : > { %v2487_v4 = vpop.eup %2486 }
0x12ba   : > { %v1713_v5 = vmul.f32 0.5, %v2487_v4  ;;  %v2489_v7 = vpop.eup %2488  ;;  %v1821_v26 = vpop.permute.xlu1 %1820 }
0x12bb   : > { %v1795_v11 = vmul.f32 0.5, %v2489_v7 }
0x12bc   : > { %v1714_v6 = vadd.f32 0.5, %v1713_v5 }
0x12bd   : > { %v1796_v13 = vadd.f32 0.5, %v1795_v11 }
0x12be   : > { %v1720_v15 = vmul.f32 %v1718_v14, %v1714_v6 }
0x12bf   : > { %v1807_v54 = vmul.f32 %v1805_v12, %v1796_v13  ;;  %v1802_v20 = vmul.f32 %v1800_v19, %v1796_v13 }
0x1312   : > { %v1723_v8 = vpop.permute.xlu2 %1722 }
0x1313   : > { %v1725_v9 = vmul.f32 %v1723_v8, %v1714_v6 }
0x1315   : > { %1727 = vrot.lane.b32.xlu2 %v1725_v9, %s2529_s16 }
0x131d   : > { %1809 = vrot.lane.b32.xlu2 %v1807_v54, %s2529_s16 }
0x136f   : > { %v1728_v16 = vpop.permute.xlu2 %1727 }
0x1370   : > { %v1730_v17 = vadd.f32 %v1728_v16, %v1720_v15 }
0x1372   : > { %2490 = vtanh.f32 %v1730_v17  ;;  %v1741_v18 = vsel %vm1574_vm10, %v1730_v17, %v1718_v14 }
0x1373   : > { %1748 = vrot.lane.b32.xlu1 %v1741_v18, %s2531_s20 }
0x1377   : > { %v1810_v21 = vpop.permute.xlu2 %1809 }
0x1378   : > { %v2491_v22 = vpop.eup %2490  ;;  %v1812_v23 = vadd.f32 %v1810_v21, %v1802_v20 }
0x1379   : > { %1733 = vrot.lane.b32.xlu0 %v2491_v22, %s2528_s15 }
0x137a   : > { %2492 = vtanh.f32 %v1812_v23  ;;  %v1824_v59 = vsel %vm1754_vm11, %v1812_v23, %v1800_v19 }
0x1380   : > { %v2493_v24 = vpop.eup %2492 }
0x1381   : > { %1815 = vrot.lane.b32.xlu0 %v2493_v24, %s2528_s15 }
0x13e5   : > { %v1749_v27 = vpop.permute.xlu1 %1748 }
0x13e6   : > { %1751 = vst.msk [vmem:[#allocation3 + $0x8] sm:$0xff] %vm512_vm1, %v1749_v27 }
0x13eb   : > { %v1734_v28 = vpop.permute.xlu0 %1733 }
0x13ec   : > { %v1736_v29 = vmul.f32 %v1734_v28, %v1714_v6 }
0x13ed   : > { %v1836_v43 = vld [vmem:[#allocation3 + $0x8] sm:$0xff] }
0x13ee   : > { %v1740_v30 = vsel %vm1574_vm10, %v1736_v29, %v1738_v25 }
0x13ef   : > { %1743 = vrot.lane.b32.xlu2 %v1740_v30, %s2529_s16 }
0x13f3   : > { %v1816_v33 = vpop.permute.xlu0 %1815 }
0x13f4   : > { %v1818_v35 = vmul.f32 %v1816_v33, %v1796_v13 }
0x13f6   : > { %v1823_v39 = vsel %vm1754_vm11, %v1818_v35, %v1821_v26 }
0x13f7   : > { %1826 = vrot.lane.b32.xlu2 %v1823_v39, %s2529_s16 }
0x1449   : > { %v1744_v36 = vpop.permute.xlu2 %1743 }
0x144a   : > { %1746 = vst.msk [vmem:[#allocation2 + $0x8] sm:$0xff] %vm512_vm1, %v1744_v36 }
0x1451   : > { %v1827_v41 = vpop.permute.xlu2 %1826  ;;  %v1835_v42 = vld [vmem:[#allocation2 + $0x8] sm:$0xff] }
0x1452   : > { %1829 = vst.msk [vmem:[#allocation2] sm:$0xff] %vm512_vm1, %v1827_v41  ;;  %1838 = vrot.lane.b32.xlu0 %v1835_v42, %s2529_s16 }
0x145a   : > { %1897 = vrot.lane.b32.xlu0 %v1836_v43, %s2529_s16 }
0x1462   : > { %1917 = vrot.lane.b32.xlu0 %v1835_v42, %s2531_s20 }
0x14c4   : > { %v1839_v44 = vpop.permute.xlu0 %1838 }
0x14c5   : > { %v1841_v45 = vsel %vm512_vm1, %v1827_v41, %v1839_v44 }
0x14c6   : > { %v1842_v46 = vpack.c.bf16 %v1841_v45, %v1841_v45 }
0x14c8   : > { %2300 = vmatmul.msk.bf16.vlgmr.msra.gmra.mxu2 %vm614_vm4, %v1842_v46 }
0x14cc   : > { %v1898_v60 = vpop.permute.xlu0 %1897 }
0x14d4   : > { %v1918_v10 = vpop.permute.xlu0 %1917 }
0x154b   : > { %v1887_v47 = vpop.f32.mrf.mxu2 }
0x154c   : > { %v1888_v48 = vadd.f32 %v3060_v0, %v1887_v47 }
0x154e   : > { %2494 = vtanh.f32 %v1888_v48  ;;  %v1891_v51 = vmul.f32 0.5, %v1888_v48 }
0x1550   : > { %2496 = vtanh.f32 %v1891_v51 }
0x1553   : > { %v1889_v49 = vpop.f32.mrf.mxu2 }
0x1554   : > { %v2495_v50 = vpop.eup %2494 }
0x1555   : > { %1902 = vrot.lane.b32.xlu2 %v2495_v50, %s2528_s15 }
0x1556   : > { %v2497_v52 = vpop.eup %2496 }
0x1557   : > { %v1893_v53 = vmul.f32 0.5, %v2497_v52 }
0x1559   : > { %v1894_v55 = vadd.f32 0.5, %v1893_v53 }
0x155b   : > { %v1900_v61 = vmul.f32 %v1898_v60, %v1894_v55 }
0x15af   : > { %v1903_v56 = vpop.permute.xlu2 %1902 }
0x15b0   : > { %v1905_v57 = vmul.f32 %v1903_v56, %v1894_v55 }
0x15b2   : > { %1907 = vrot.lane.b32.xlu1 %v1905_v57, %s2529_s16 }
0x15ba   : > { %1831 = vrot.lane.b32.xlu1 %v1824_v59, %s2531_s20 }
0x1624   : > { %v1908_v62 = vpop.permute.xlu1 %1907 }
0x1625   : > { %v1910_v63 = vadd.f32 %v1908_v62, %v1900_v61 }
0x1627   : > { %2498 = vtanh.f32 %v1910_v63  ;;  %v1921_v0 = vsel %vm1754_vm11, %v1910_v63, %v1898_v60 }
0x1628   : > { %1928 = vrot.lane.b32.xlu0 %v1921_v0, %s2531_s20 }
0x162c   : > { %v1832_v1 = vpop.permute.xlu1 %1831 }
0x162d   : > { %v2499_v58 = vpop.eup %2498  ;;  %1834 = vst.msk [vmem:[#allocation3] sm:$0xff] %vm512_vm1, %v1832_v1 }
0x162e   : > { %1913 = vrot.lane.b32.xlu2 %v2499_v58, %s2528_s15 }
0x1688   : > { %v1914_v2 = vpop.permute.xlu2 %1913 }
0x1689   : > { %v1916_v3 = vmul.f32 %v1914_v2, %v1894_v55 }
0x168b   : > { %v1920_v4 = vsel %vm1754_vm11, %v1916_v3, %v1918_v10 }
0x168c   : > { %1923 = vrot.lane.b32.xlu2 %v1920_v4, %s2529_s16 }
0x169a   : > { %v1929_v5 = vpop.permute.xlu0 %1928 }
0x169b   : > { %1931 = vst.msk [vmem:[#allocation3 + $0x8] sm:$0xff] %vm512_vm1, %v1929_v5 }
0x16e3   : > { %1935 = sbr.rel (%p2301_p6) target bundleno = 6007 (0x1777), region = 64 }
0x16e6   : > { %v1924_v6 = vpop.permute.xlu2 %1923 }
0x16e7   : > { %1926 = vst.msk [vmem:[#allocation2 + $0x8] sm:$0xff] %vm512_vm1, %v1924_v6 }
0x16e8   : > { %v2370_v7 = vld [vmem:[%s3147_s7 + $0x8] sm:$0xff]  ;;  %v2369_v34 = vld [vmem:[%s3147_s7] sm:$0xff] }
0x16e9   : > { %1967 = vmatpush.bf16.msra.mxu0 %v2370_v7  ;;  %v2502_v11 = vld [vmem:[%s3148_s8] ss:$0 sm:$0xff] }
0x16ed   : > { %1968 = vmatpush.bf16.msra.mxu0 %v2369_v34 }
0x16ee   : > { %v1936_v8 = vld [vmem:[#allocation2 + $0x8] sm:$0xff] }
0x16ef   : > { %v1937_v9 = vpack.c.bf16 %v1936_v8, %v1936_v8 }
0x16f1   : > { %2310 = vmatmul.msk.bf16.vlgmr.msra.gmra.mxu0 %vm512_vm1, %v1937_v9 }
0x176e   : > { %v1970_v12 = vpop.f32.mrf.mxu0 }
0x176f   : > { %v1971_v13 = vadd.f32 %v2502_v11, %v1970_v12 }
0x1771   : > { %1974 = vst [vmem:[%s3149_s9] sm:$0xff] %v1971_v13 }
0x1776   : > { %v1972_v54 = vpop.f32.mrf.mxu0 }
0x1777 PF: > { %s19_s11 = sadd.s32 1, %s2525_s11   ;;  %s3152_s30 = smov %s2521_s10 }
0x1778   : > { %p16_p7 = scmp.ge.s32.totalorder %s19_s11, 4   ;;  %s3153_s10 = smov %s3155_s12 }
0x177a   :  { %18 = sbr.rel (!%p16_p7) target bundleno = 2 (0x2), region = 106 }

</bundles_post_ra>
